<compile_context>
chip_gen: v5e
topology: v5e:2x2
jax: 0.10.0
libtpu: 0.0.40
codegen_flags: <defaults>
</compile_context>

<pallas_src>
import functools

import jax
import jax.numpy as jnp
from jax import lax
from jax.experimental import pallas as pl
from jax.experimental.pallas import tpu as pltpu


# ----------------------------- Pallas kernel --------------------------------

def _down_conv_fused_kernel(*refs, K, n_layers, pooling):
    """Fused conv_per_block x (Conv1d 'same' + ReLU) + optional MaxPool1d(2,2).

    refs = [x, w_0, b_0, ..., w_{n-1}, b_{n-1}] + outputs + [pad_scratch]
      x:    (Cin, L)            one batch element, NCL layout (L on lanes)
      w_i:  (K, Cout, Cin_i)    conv weights, w_i[t, co, ci] = w_torch[co, ci, t]
      b_i:  (Cout, 1)           bias column (lane-broadcasts over L)
      outputs: (pool (Cout, L//2) if pooling) , before_pool (Cout, L)
      pad_scratch: (Cmax, L + 2P) f32 VMEM scratch for the zero halo
    """
    P = (K - 1) // 2
    x_ref = refs[0]
    wb_refs = refs[1:1 + 2 * n_layers]
    idx = 1 + 2 * n_layers
    if pooling:
        pool_ref, before_ref, pad_ref = refs[idx], refs[idx + 1], refs[idx + 2]
    else:
        pool_ref = None
        before_ref, pad_ref = refs[idx], refs[idx + 1]

    cin, L = x_ref.shape
    h = x_ref[...].astype(jnp.float32)                      # (cin, L)

    for layer in range(n_layers):
        w_ref = wb_refs[2 * layer]                          # (K, cout, cin)
        b_ref = wb_refs[2 * layer + 1]                      # (cout, 1)
        cout = w_ref.shape[1]

        # Zero-fill halo + stage the current activation in VMEM scratch.
        pad_ref[...] = jnp.zeros_like(pad_ref)
        pad_ref[pl.ds(0, cin), pl.ds(P, L)] = h

        # 'same' conv as K*cin unrolled rank-1 VPU updates on a (cout, L) tile.
        acc = jnp.zeros((cout, L), jnp.float32)
        for t in range(K):                                  # taps (static)
            w_t = w_ref[t].astype(jnp.float32)              # (cout, cin)
            for ci in range(cin):                           # in-channels (static)
                row = pad_ref[pl.ds(ci, 1), pl.ds(t, L)]    # (1, L) window row
                acc = acc + w_t[:, ci:ci + 1] * row         # (cout,1)*(1,L)
        acc = acc + b_ref[...].astype(jnp.float32)
        h = jnp.maximum(acc, 0.0)                           # ReLU
        cin = cout

    before_ref[...] = h.astype(before_ref.dtype)

    if pooling:
        Lo = L // 2
        # MaxPool1d(2,2) along L on data already in vregs: deinterleave
        # even/odd lanes with exact 0/1 selection matmuls (robust lane
        # compaction on TPU), then an elementwise max.
        l_idx = lax.broadcasted_iota(jnp.int32, (L, Lo), 0)
        j_idx = lax.broadcasted_iota(jnp.int32, (L, Lo), 1)
        sel_even = (l_idx == 2 * j_idx).astype(jnp.float32)
        sel_odd = (l_idx == 2 * j_idx + 1).astype(jnp.float32)
        even = jnp.dot(h, sel_even, preferred_element_type=jnp.float32)
        odd = jnp.dot(h, sel_odd, preferred_element_type=jnp.float32)
        pool_ref[...] = jnp.maximum(even, odd).astype(pool_ref.dtype)


# ------------------------------ JAX wrapper ----------------------------------

def down_conv_forward(x_ncl, params, pooling=True):
    """Forward pass of DownConv. x_ncl: (N, C, L) like PyTorch.
    Returns (x_pooled, before_pool), both in NCL layout."""
    N, Cin, L = x_ncl.shape
    K = params[0][0].shape[-1]
    assert K % 2 == 1, "fused kernel assumes odd kernel_size ('same' conv)"
    n_layers = len(params)
    Cout = params[-1][0].shape[0]
    P = (K - 1) // 2
    Lo = L // 2
    dtype = x_ncl.dtype

    kernel_inputs = [x_ncl]
    in_specs = [pl.BlockSpec((None, Cin, L), lambda n: (n, 0, 0))]

    flops = 0
    bytes_accessed = x_ncl.size * x_ncl.dtype.itemsize
    cin = Cin
    cmax = Cin
    for (w, b) in params:
        cout = w.shape[0]
        # PyTorch Conv1d weight (Cout, Cin, K) -> (K, Cout, Cin); bias -> column.
        w_k = jnp.transpose(w, (2, 0, 1))
        b_c = b.reshape(cout, 1)
        kernel_inputs += [w_k, b_c]
        in_specs += [
            pl.BlockSpec((K, cout, cin), lambda n: (0, 0, 0)),
            pl.BlockSpec((cout, 1), lambda n: (0, 0)),
        ]
        flops += 2 * N * L * K * cin * cout
        bytes_accessed += w.size * w.dtype.itemsize + b.size * b.dtype.itemsize
        cmax = max(cmax, cout)
        cin = cout

    out_shapes = []
    out_specs = []
    if pooling:
        out_shapes.append(jax.ShapeDtypeStruct((N, Cout, Lo), dtype))
        out_specs.append(pl.BlockSpec((None, Cout, Lo), lambda n: (n, 0, 0)))
        flops += N * Cout * L
        bytes_accessed += N * Cout * Lo * x_ncl.dtype.itemsize
    out_shapes.append(jax.ShapeDtypeStruct((N, Cout, L), dtype))
    out_specs.append(pl.BlockSpec((None, Cout, L), lambda n: (n, 0, 0)))
    bytes_accessed += N * Cout * L * x_ncl.dtype.itemsize

    kernel = functools.partial(_down_conv_fused_kernel, K=K,
                               n_layers=n_layers, pooling=pooling)

    outs = pl.pallas_call(
        kernel,
        out_shape=tuple(out_shapes),
        grid=(N,),
        in_specs=in_specs,
        out_specs=tuple(out_specs),
        scratch_shapes=[pltpu.VMEM((cmax, L + 2 * P), jnp.float32)],
        compiler_params=pltpu.CompilerParams(
            dimension_semantics=("parallel",)),
        cost_estimate=pl.CostEstimate(
            flops=int(flops), transcendentals=0,
            bytes_accessed=int(bytes_accessed)),
    )(*kernel_inputs)

    if pooling:
        pooled, before_pool = outs
    else:
        (before_pool,) = outs
        pooled = before_pool
    return pooled, before_pool


def init_downconv_params(key, in_channels, out_channels, conv_per_block,
                         kernel_size):
    """Deterministic PyTorch-default-style init (U(-1/sqrt(fan_in), +...))."""
    params = []
    cin = in_channels
    for _ in range(conv_per_block):
        key, kw, kb = jax.random.split(key, 3)
        fan_in = cin * kernel_size
        bound = 1.0 / (fan_in ** 0.5)
        # PyTorch Conv1d weight layout: (Cout, Cin, K)
        w = jax.random.uniform(kw, (out_channels, cin, kernel_size),
                               jnp.float32, -bound, bound)
        b = jax.random.uniform(kb, (out_channels,), jnp.float32, -bound, bound)
        params.append((w, b))
        cin = out_channels
    return params


# --------------------------- plain-JAX reference ----------------------------

def ref_forward(x_ncl, params, pooling=True):
    x = x_ncl
    for (w, b) in params:
        K = w.shape[-1]
        P = (K - 1) // 2
        x = lax.conv_general_dilated(
            x, w, window_strides=(1,), padding=[(P, P)],
            dimension_numbers=("NCH", "OIH", "NCH"))
        x = jax.nn.relu(x + b[None, :, None])
    before_pool = x
    if pooling:
        x = lax.reduce_window(x, -jnp.inf, lax.max,
                              (1, 1, 2), (1, 1, 2), "VALID")
    return x, before_pool


# ---------------------------------- main -------------------------------------

if __name__ == "__main__":
    N, Cin, Cout, L = 2, 4, 8, 16
    conv_per_block, kernel_size = 2, 5

    key = jax.random.PRNGKey(0)
    key, kx = jax.random.split(key)
    x = jax.random.normal(kx, (N, Cin, L), jnp.float32)  # NCL, like nn.Conv1d

    params = init_downconv_params(key, Cin, Cout, conv_per_block, kernel_size)

    out, before_pool = down_conv_forward(x, params, pooling=True)
    out = jax.block_until_ready(out)
    before_pool = jax.block_until_ready(before_pool)

    ref_out, ref_before = ref_forward(x, params, pooling=True)
    assert out.shape == (N, Cout, L // 2), out.shape
    assert before_pool.shape == (N, Cout, L), before_pool.shape
    assert jnp.allclose(out, ref_out, rtol=1e-4, atol=1e-5)
    assert jnp.allclose(before_pool, ref_before, rtol=1e-4, atol=1e-5)

    print("KERNEL_OK")
</pallas_src>

<mosaic_0001>
module attributes {stable_mosaic.version = 11 : i64} {
  func.func @_down_conv_fused_kernel(%arg0: i32, %arg1: memref<1x4x16xf32, #tpu.memory_space<vmem>>, %arg2: memref<5x8x4xf32, #tpu.memory_space<vmem>>, %arg3: memref<8x1xf32, #tpu.memory_space<vmem>>, %arg4: memref<5x8x8xf32, #tpu.memory_space<vmem>>, %arg5: memref<8x1xf32, #tpu.memory_space<vmem>>, %arg6: memref<1x8x8xf32, #tpu.memory_space<vmem>>, %arg7: memref<1x8x16xf32, #tpu.memory_space<vmem>>, %arg8: memref<8x20xf32, #tpu.memory_space<vmem>>) attributes {dimension_semantics = [#tpu.dimension_semantics<parallel>], iteration_bounds = array<i64: 2>, scalar_prefetch = 0 : i64, scratch_operands = 1 : i64, tpu.core_type = #tpu.core_type<tc>, window_params = [{transform_indices = @transform_0, window_bounds = array<i64: 1, 4, 16>}, {pipeline_mode = #tpu.pipeline_mode<synchronous>, transform_indices = @transform_1, window_bounds = array<i64: 5, 8, 4>}, {pipeline_mode = #tpu.pipeline_mode<synchronous>, transform_indices = @transform_2, window_bounds = array<i64: 8, 1>}, {pipeline_mode = #tpu.pipeline_mode<synchronous>, transform_indices = @transform_3, window_bounds = array<i64: 5, 8, 8>}, {pipeline_mode = #tpu.pipeline_mode<synchronous>, transform_indices = @transform_4, window_bounds = array<i64: 8, 1>}, {transform_indices = @transform_5, window_bounds = array<i64: 1, 8, 8>}, {transform_indices = @transform_6, window_bounds = array<i64: 1, 8, 16>}]} {
    %c0 = arith.constant 0 : index
    %c0_0 = arith.constant 0 : index
    %c0_1 = arith.constant 0 : index
    %0 = vector.load %arg1[%c0, %c0_0, %c0_1] : memref<1x4x16xf32, #tpu.memory_space<vmem>>, vector<1x4x16xf32>
    %1 = vector.shape_cast %0 : vector<1x4x16xf32> to vector<4x16xf32>
    %cst = arith.constant 0.000000e+00 : f32
    %2 = vector.broadcast %cst : f32 to vector<8x20xf32>
    %c0_2 = arith.constant 0 : index
    %c0_3 = arith.constant 0 : index
    %3 = vector.load %arg8[%c0_2, %c0_3] : memref<8x20xf32, #tpu.memory_space<vmem>>, vector<8x20xf32>
    tpu.vector_store %arg8[%c0_2, %c0_3], %2 {strides = array<i32>} : memref<8x20xf32, #tpu.memory_space<vmem>>, vector<8x20xf32>,
    %c0_4 = arith.constant 0 : index
    %c2 = arith.constant 2 : index
    %4 = vector.load %arg8[%c0_4, %c2] : memref<8x20xf32, #tpu.memory_space<vmem>>, vector<4x16xf32>
    tpu.vector_store %arg8[%c0_4, %c2], %1 {strides = array<i32>} : memref<8x20xf32, #tpu.memory_space<vmem>>, vector<4x16xf32>,
    %cst_5 = arith.constant 0.000000e+00 : f32
    %5 = vector.broadcast %cst_5 : f32 to vector<8x16xf32>
    %c0_6 = arith.constant 0 : index
    %c0_7 = arith.constant 0 : index
    %c0_8 = arith.constant 0 : index
    %6 = vector.load %arg2[%c0_6, %c0_7, %c0_8] : memref<5x8x4xf32, #tpu.memory_space<vmem>>, vector<1x8x4xf32>
    %7 = vector.shape_cast %6 : vector<1x8x4xf32> to vector<8x4xf32>
    %c0_9 = arith.constant 0 : index
    %c0_10 = arith.constant 0 : index
    %8 = vector.load %arg8[%c0_9, %c0_10] : memref<8x20xf32, #tpu.memory_space<vmem>>, vector<1x16xf32>
    %9 = vector.extract_strided_slice %7 {offsets = [0, 0], sizes = [8, 1], strides = [1, 1]} : vector<8x4xf32> to vector<8x1xf32>
    %10 = vector.broadcast %9 : vector<8x1xf32> to vector<8x16xf32>
    %11 = vector.broadcast %8 : vector<1x16xf32> to vector<8x16xf32>
    %12 = arith.mulf %10, %11 : vector<8x16xf32>
    %13 = arith.addf %5, %12 : vector<8x16xf32>
    %c1 = arith.constant 1 : index
    %c0_11 = arith.constant 0 : index
    %14 = vector.load %arg8[%c1, %c0_11] : memref<8x20xf32, #tpu.memory_space<vmem>>, vector<1x16xf32>
    %15 = vector.extract_strided_slice %7 {offsets = [0, 1], sizes = [8, 1], strides = [1, 1]} : vector<8x4xf32> to vector<8x1xf32>
    %16 = vector.broadcast %15 : vector<8x1xf32> to vector<8x16xf32>
    %17 = vector.broadcast %14 : vector<1x16xf32> to vector<8x16xf32>
    %18 = arith.mulf %16, %17 : vector<8x16xf32>
    %19 = arith.addf %13, %18 : vector<8x16xf32>
    %c2_12 = arith.constant 2 : index
    %c0_13 = arith.constant 0 : index
    %20 = vector.load %arg8[%c2_12, %c0_13] : memref<8x20xf32, #tpu.memory_space<vmem>>, vector<1x16xf32>
    %21 = vector.extract_strided_slice %7 {offsets = [0, 2], sizes = [8, 1], strides = [1, 1]} : vector<8x4xf32> to vector<8x1xf32>
    %22 = vector.broadcast %21 : vector<8x1xf32> to vector<8x16xf32>
    %23 = vector.broadcast %20 : vector<1x16xf32> to vector<8x16xf32>
    %24 = arith.mulf %22, %23 : vector<8x16xf32>
    %25 = arith.addf %19, %24 : vector<8x16xf32>
    %c3 = arith.constant 3 : index
    %c0_14 = arith.constant 0 : index
    %26 = vector.load %arg8[%c3, %c0_14] : memref<8x20xf32, #tpu.memory_space<vmem>>, vector<1x16xf32>
    %27 = vector.extract_strided_slice %7 {offsets = [0, 3], sizes = [8, 1], strides = [1, 1]} : vector<8x4xf32> to vector<8x1xf32>
    %28 = vector.broadcast %27 : vector<8x1xf32> to vector<8x16xf32>
    %29 = vector.broadcast %26 : vector<1x16xf32> to vector<8x16xf32>
    %30 = arith.mulf %28, %29 : vector<8x16xf32>
    %31 = arith.addf %25, %30 : vector<8x16xf32>
    %c1_15 = arith.constant 1 : index
    %c0_16 = arith.constant 0 : index
    %c0_17 = arith.constant 0 : index
    %32 = vector.load %arg2[%c1_15, %c0_16, %c0_17] : memref<5x8x4xf32, #tpu.memory_space<vmem>>, vector<1x8x4xf32>
    %33 = vector.shape_cast %32 : vector<1x8x4xf32> to vector<8x4xf32>
    %c0_18 = arith.constant 0 : index
    %c1_19 = arith.constant 1 : index
    %34 = vector.load %arg8[%c0_18, %c1_19] : memref<8x20xf32, #tpu.memory_space<vmem>>, vector<1x16xf32>
    %35 = vector.extract_strided_slice %33 {offsets = [0, 0], sizes = [8, 1], strides = [1, 1]} : vector<8x4xf32> to vector<8x1xf32>
    %36 = vector.broadcast %35 : vector<8x1xf32> to vector<8x16xf32>
    %37 = vector.broadcast %34 : vector<1x16xf32> to vector<8x16xf32>
    %38 = arith.mulf %36, %37 : vector<8x16xf32>
    %39 = arith.addf %31, %38 : vector<8x16xf32>
    %c1_20 = arith.constant 1 : index
    %c1_21 = arith.constant 1 : index
    %40 = vector.load %arg8[%c1_20, %c1_21] : memref<8x20xf32, #tpu.memory_space<vmem>>, vector<1x16xf32>
    %41 = vector.extract_strided_slice %33 {offsets = [0, 1], sizes = [8, 1], strides = [1, 1]} : vector<8x4xf32> to vector<8x1xf32>
    %42 = vector.broadcast %41 : vector<8x1xf32> to vector<8x16xf32>
    %43 = vector.broadcast %40 : vector<1x16xf32> to vector<8x16xf32>
    %44 = arith.mulf %42, %43 : vector<8x16xf32>
    %45 = arith.addf %39, %44 : vector<8x16xf32>
    %c2_22 = arith.constant 2 : index
    %c1_23 = arith.constant 1 : index
    %46 = vector.load %arg8[%c2_22, %c1_23] : memref<8x20xf32, #tpu.memory_space<vmem>>, vector<1x16xf32>
    %47 = vector.extract_strided_slice %33 {offsets = [0, 2], sizes = [8, 1], strides = [1, 1]} : vector<8x4xf32> to vector<8x1xf32>
    %48 = vector.broadcast %47 : vector<8x1xf32> to vector<8x16xf32>
    %49 = vector.broadcast %46 : vector<1x16xf32> to vector<8x16xf32>
    %50 = arith.mulf %48, %49 : vector<8x16xf32>
    %51 = arith.addf %45, %50 : vector<8x16xf32>
    %c3_24 = arith.constant 3 : index
    %c1_25 = arith.constant 1 : index
    %52 = vector.load %arg8[%c3_24, %c1_25] : memref<8x20xf32, #tpu.memory_space<vmem>>, vector<1x16xf32>
    %53 = vector.extract_strided_slice %33 {offsets = [0, 3], sizes = [8, 1], strides = [1, 1]} : vector<8x4xf32> to vector<8x1xf32>
    %54 = vector.broadcast %53 : vector<8x1xf32> to vector<8x16xf32>
    %55 = vector.broadcast %52 : vector<1x16xf32> to vector<8x16xf32>
    %56 = arith.mulf %54, %55 : vector<8x16xf32>
    %57 = arith.addf %51, %56 : vector<8x16xf32>
    %c2_26 = arith.constant 2 : index
    %c0_27 = arith.constant 0 : index
    %c0_28 = arith.constant 0 : index
    %58 = vector.load %arg2[%c2_26, %c0_27, %c0_28] : memref<5x8x4xf32, #tpu.memory_space<vmem>>, vector<1x8x4xf32>
    %59 = vector.shape_cast %58 : vector<1x8x4xf32> to vector<8x4xf32>
    %c0_29 = arith.constant 0 : index
    %c2_30 = arith.constant 2 : index
    %60 = vector.load %arg8[%c0_29, %c2_30] : memref<8x20xf32, #tpu.memory_space<vmem>>, vector<1x16xf32>
    %61 = vector.extract_strided_slice %59 {offsets = [0, 0], sizes = [8, 1], strides = [1, 1]} : vector<8x4xf32> to vector<8x1xf32>
    %62 = vector.broadcast %61 : vector<8x1xf32> to vector<8x16xf32>
    %63 = vector.broadcast %60 : vector<1x16xf32> to vector<8x16xf32>
    %64 = arith.mulf %62, %63 : vector<8x16xf32>
    %65 = arith.addf %57, %64 : vector<8x16xf32>
    %c1_31 = arith.constant 1 : index
    %c2_32 = arith.constant 2 : index
    %66 = vector.load %arg8[%c1_31, %c2_32] : memref<8x20xf32, #tpu.memory_space<vmem>>, vector<1x16xf32>
    %67 = vector.extract_strided_slice %59 {offsets = [0, 1], sizes = [8, 1], strides = [1, 1]} : vector<8x4xf32> to vector<8x1xf32>
    %68 = vector.broadcast %67 : vector<8x1xf32> to vector<8x16xf32>
    %69 = vector.broadcast %66 : vector<1x16xf32> to vector<8x16xf32>
    %70 = arith.mulf %68, %69 : vector<8x16xf32>
    %71 = arith.addf %65, %70 : vector<8x16xf32>
    %c2_33 = arith.constant 2 : index
    %c2_34 = arith.constant 2 : index
    %72 = vector.load %arg8[%c2_33, %c2_34] : memref<8x20xf32, #tpu.memory_space<vmem>>, vector<1x16xf32>
    %73 = vector.extract_strided_slice %59 {offsets = [0, 2], sizes = [8, 1], strides = [1, 1]} : vector<8x4xf32> to vector<8x1xf32>
    %74 = vector.broadcast %73 : vector<8x1xf32> to vector<8x16xf32>
    %75 = vector.broadcast %72 : vector<1x16xf32> to vector<8x16xf32>
    %76 = arith.mulf %74, %75 : vector<8x16xf32>
    %77 = arith.addf %71, %76 : vector<8x16xf32>
    %c3_35 = arith.constant 3 : index
    %c2_36 = arith.constant 2 : index
    %78 = vector.load %arg8[%c3_35, %c2_36] : memref<8x20xf32, #tpu.memory_space<vmem>>, vector<1x16xf32>
    %79 = vector.extract_strided_slice %59 {offsets = [0, 3], sizes = [8, 1], strides = [1, 1]} : vector<8x4xf32> to vector<8x1xf32>
    %80 = vector.broadcast %79 : vector<8x1xf32> to vector<8x16xf32>
    %81 = vector.broadcast %78 : vector<1x16xf32> to vector<8x16xf32>
    %82 = arith.mulf %80, %81 : vector<8x16xf32>
    %83 = arith.addf %77, %82 : vector<8x16xf32>
    %c3_37 = arith.constant 3 : index
    %c0_38 = arith.constant 0 : index
    %c0_39 = arith.constant 0 : index
    %84 = vector.load %arg2[%c3_37, %c0_38, %c0_39] : memref<5x8x4xf32, #tpu.memory_space<vmem>>, vector<1x8x4xf32>
    %85 = vector.shape_cast %84 : vector<1x8x4xf32> to vector<8x4xf32>
    %c0_40 = arith.constant 0 : index
    %c3_41 = arith.constant 3 : index
    %86 = vector.load %arg8[%c0_40, %c3_41] : memref<8x20xf32, #tpu.memory_space<vmem>>, vector<1x16xf32>
    %87 = vector.extract_strided_slice %85 {offsets = [0, 0], sizes = [8, 1], strides = [1, 1]} : vector<8x4xf32> to vector<8x1xf32>
    %88 = vector.broadcast %87 : vector<8x1xf32> to vector<8x16xf32>
    %89 = vector.broadcast %86 : vector<1x16xf32> to vector<8x16xf32>
    %90 = arith.mulf %88, %89 : vector<8x16xf32>
    %91 = arith.addf %83, %90 : vector<8x16xf32>
    %c1_42 = arith.constant 1 : index
    %c3_43 = arith.constant 3 : index
    %92 = vector.load %arg8[%c1_42, %c3_43] : memref<8x20xf32, #tpu.memory_space<vmem>>, vector<1x16xf32>
    %93 = vector.extract_strided_slice %85 {offsets = [0, 1], sizes = [8, 1], strides = [1, 1]} : vector<8x4xf32> to vector<8x1xf32>
    %94 = vector.broadcast %93 : vector<8x1xf32> to vector<8x16xf32>
    %95 = vector.broadcast %92 : vector<1x16xf32> to vector<8x16xf32>
    %96 = arith.mulf %94, %95 : vector<8x16xf32>
    %97 = arith.addf %91, %96 : vector<8x16xf32>
    %c2_44 = arith.constant 2 : index
    %c3_45 = arith.constant 3 : index
    %98 = vector.load %arg8[%c2_44, %c3_45] : memref<8x20xf32, #tpu.memory_space<vmem>>, vector<1x16xf32>
    %99 = vector.extract_strided_slice %85 {offsets = [0, 2], sizes = [8, 1], strides = [1, 1]} : vector<8x4xf32> to vector<8x1xf32>
    %100 = vector.broadcast %99 : vector<8x1xf32> to vector<8x16xf32>
    %101 = vector.broadcast %98 : vector<1x16xf32> to vector<8x16xf32>
    %102 = arith.mulf %100, %101 : vector<8x16xf32>
    %103 = arith.addf %97, %102 : vector<8x16xf32>
    %c3_46 = arith.constant 3 : index
    %c3_47 = arith.constant 3 : index
    %104 = vector.load %arg8[%c3_46, %c3_47] : memref<8x20xf32, #tpu.memory_space<vmem>>, vector<1x16xf32>
    %105 = vector.extract_strided_slice %85 {offsets = [0, 3], sizes = [8, 1], strides = [1, 1]} : vector<8x4xf32> to vector<8x1xf32>
    %106 = vector.broadcast %105 : vector<8x1xf32> to vector<8x16xf32>
    %107 = vector.broadcast %104 : vector<1x16xf32> to vector<8x16xf32>
    %108 = arith.mulf %106, %107 : vector<8x16xf32>
    %109 = arith.addf %103, %108 : vector<8x16xf32>
    %c4 = arith.constant 4 : index
    %c0_48 = arith.constant 0 : index
    %c0_49 = arith.constant 0 : index
    %110 = vector.load %arg2[%c4, %c0_48, %c0_49] : memref<5x8x4xf32, #tpu.memory_space<vmem>>, vector<1x8x4xf32>
    %111 = vector.shape_cast %110 : vector<1x8x4xf32> to vector<8x4xf32>
    %c0_50 = arith.constant 0 : index
    %c4_51 = arith.constant 4 : index
    %112 = vector.load %arg8[%c0_50, %c4_51] : memref<8x20xf32, #tpu.memory_space<vmem>>, vector<1x16xf32>
    %113 = vector.extract_strided_slice %111 {offsets = [0, 0], sizes = [8, 1], strides = [1, 1]} : vector<8x4xf32> to vector<8x1xf32>
    %114 = vector.broadcast %113 : vector<8x1xf32> to vector<8x16xf32>
    %115 = vector.broadcast %112 : vector<1x16xf32> to vector<8x16xf32>
    %116 = arith.mulf %114, %115 : vector<8x16xf32>
    %117 = arith.addf %109, %116 : vector<8x16xf32>
    %c1_52 = arith.constant 1 : index
    %c4_53 = arith.constant 4 : index
    %118 = vector.load %arg8[%c1_52, %c4_53] : memref<8x20xf32, #tpu.memory_space<vmem>>, vector<1x16xf32>
    %119 = vector.extract_strided_slice %111 {offsets = [0, 1], sizes = [8, 1], strides = [1, 1]} : vector<8x4xf32> to vector<8x1xf32>
    %120 = vector.broadcast %119 : vector<8x1xf32> to vector<8x16xf32>
    %121 = vector.broadcast %118 : vector<1x16xf32> to vector<8x16xf32>
    %122 = arith.mulf %120, %121 : vector<8x16xf32>
    %123 = arith.addf %117, %122 : vector<8x16xf32>
    %c2_54 = arith.constant 2 : index
    %c4_55 = arith.constant 4 : index
    %124 = vector.load %arg8[%c2_54, %c4_55] : memref<8x20xf32, #tpu.memory_space<vmem>>, vector<1x16xf32>
    %125 = vector.extract_strided_slice %111 {offsets = [0, 2], sizes = [8, 1], strides = [1, 1]} : vector<8x4xf32> to vector<8x1xf32>
    %126 = vector.broadcast %125 : vector<8x1xf32> to vector<8x16xf32>
    %127 = vector.broadcast %124 : vector<1x16xf32> to vector<8x16xf32>
    %128 = arith.mulf %126, %127 : vector<8x16xf32>
    %129 = arith.addf %123, %128 : vector<8x16xf32>
    %c3_56 = arith.constant 3 : index
    %c4_57 = arith.constant 4 : index
    %130 = vector.load %arg8[%c3_56, %c4_57] : memref<8x20xf32, #tpu.memory_space<vmem>>, vector<1x16xf32>
    %131 = vector.extract_strided_slice %111 {offsets = [0, 3], sizes = [8, 1], strides = [1, 1]} : vector<8x4xf32> to vector<8x1xf32>
    %132 = vector.broadcast %131 : vector<8x1xf32> to vector<8x16xf32>
    %133 = vector.broadcast %130 : vector<1x16xf32> to vector<8x16xf32>
    %134 = arith.mulf %132, %133 : vector<8x16xf32>
    %135 = arith.addf %129, %134 : vector<8x16xf32>
    %c0_58 = arith.constant 0 : index
    %c0_59 = arith.constant 0 : index
    %136 = vector.load %arg3[%c0_58, %c0_59] : memref<8x1xf32, #tpu.memory_space<vmem>>, vector<8x1xf32>
    %137 = vector.broadcast %136 : vector<8x1xf32> to vector<8x16xf32>
    %138 = arith.addf %135, %137 : vector<8x16xf32>
    %cst_60 = arith.constant 0.000000e+00 : f32
    %139 = vector.broadcast %cst_60 : f32 to vector<8x16xf32>
    %140 = arith.maximumf %138, %139 : vector<8x16xf32>
    %cst_61 = arith.constant 0.000000e+00 : f32
    %141 = vector.broadcast %cst_61 : f32 to vector<8x20xf32>
    %c0_62 = arith.constant 0 : index
    %c0_63 = arith.constant 0 : index
    %142 = vector.load %arg8[%c0_62, %c0_63] : memref<8x20xf32, #tpu.memory_space<vmem>>, vector<8x20xf32>
    tpu.vector_store %arg8[%c0_62, %c0_63], %141 {strides = array<i32>} : memref<8x20xf32, #tpu.memory_space<vmem>>, vector<8x20xf32>,
    %c0_64 = arith.constant 0 : index
    %c2_65 = arith.constant 2 : index
    %143 = vector.load %arg8[%c0_64, %c2_65] : memref<8x20xf32, #tpu.memory_space<vmem>>, vector<8x16xf32>
    tpu.vector_store %arg8[%c0_64, %c2_65], %140 {strides = array<i32>} : memref<8x20xf32, #tpu.memory_space<vmem>>, vector<8x16xf32>,
    %cst_66 = arith.constant 0.000000e+00 : f32
    %144 = vector.broadcast %cst_66 : f32 to vector<8x16xf32>
    %c0_67 = arith.constant 0 : index
    %c0_68 = arith.constant 0 : index
    %c0_69 = arith.constant 0 : index
    %145 = vector.load %arg4[%c0_67, %c0_68, %c0_69] : memref<5x8x8xf32, #tpu.memory_space<vmem>>, vector<1x8x8xf32>
    %146 = vector.shape_cast %145 : vector<1x8x8xf32> to vector<8x8xf32>
    %c0_70 = arith.constant 0 : index
    %c0_71 = arith.constant 0 : index
    %147 = vector.load %arg8[%c0_70, %c0_71] : memref<8x20xf32, #tpu.memory_space<vmem>>, vector<1x16xf32>
    %148 = vector.extract_strided_slice %146 {offsets = [0, 0], sizes = [8, 1], strides = [1, 1]} : vector<8x8xf32> to vector<8x1xf32>
    %149 = vector.broadcast %148 : vector<8x1xf32> to vector<8x16xf32>
    %150 = vector.broadcast %147 : vector<1x16xf32> to vector<8x16xf32>
    %151 = arith.mulf %149, %150 : vector<8x16xf32>
    %152 = arith.addf %144, %151 : vector<8x16xf32>
    %c1_72 = arith.constant 1 : index
    %c0_73 = arith.constant 0 : index
    %153 = vector.load %arg8[%c1_72, %c0_73] : memref<8x20xf32, #tpu.memory_space<vmem>>, vector<1x16xf32>
    %154 = vector.extract_strided_slice %146 {offsets = [0, 1], sizes = [8, 1], strides = [1, 1]} : vector<8x8xf32> to vector<8x1xf32>
    %155 = vector.broadcast %154 : vector<8x1xf32> to vector<8x16xf32>
    %156 = vector.broadcast %153 : vector<1x16xf32> to vector<8x16xf32>
    %157 = arith.mulf %155, %156 : vector<8x16xf32>
    %158 = arith.addf %152, %157 : vector<8x16xf32>
    %c2_74 = arith.constant 2 : index
    %c0_75 = arith.constant 0 : index
    %159 = vector.load %arg8[%c2_74, %c0_75] : memref<8x20xf32, #tpu.memory_space<vmem>>, vector<1x16xf32>
    %160 = vector.extract_strided_slice %146 {offsets = [0, 2], sizes = [8, 1], strides = [1, 1]} : vector<8x8xf32> to vector<8x1xf32>
    %161 = vector.broadcast %160 : vector<8x1xf32> to vector<8x16xf32>
    %162 = vector.broadcast %159 : vector<1x16xf32> to vector<8x16xf32>
    %163 = arith.mulf %161, %162 : vector<8x16xf32>
    %164 = arith.addf %158, %163 : vector<8x16xf32>
    %c3_76 = arith.constant 3 : index
    %c0_77 = arith.constant 0 : index
    %165 = vector.load %arg8[%c3_76, %c0_77] : memref<8x20xf32, #tpu.memory_space<vmem>>, vector<1x16xf32>
    %166 = vector.extract_strided_slice %146 {offsets = [0, 3], sizes = [8, 1], strides = [1, 1]} : vector<8x8xf32> to vector<8x1xf32>
    %167 = vector.broadcast %166 : vector<8x1xf32> to vector<8x16xf32>
    %168 = vector.broadcast %165 : vector<1x16xf32> to vector<8x16xf32>
    %169 = arith.mulf %167, %168 : vector<8x16xf32>
    %170 = arith.addf %164, %169 : vector<8x16xf32>
    %c4_78 = arith.constant 4 : index
    %c0_79 = arith.constant 0 : index
    %171 = vector.load %arg8[%c4_78, %c0_79] : memref<8x20xf32, #tpu.memory_space<vmem>>, vector<1x16xf32>
    %172 = vector.extract_strided_slice %146 {offsets = [0, 4], sizes = [8, 1], strides = [1, 1]} : vector<8x8xf32> to vector<8x1xf32>
    %173 = vector.broadcast %172 : vector<8x1xf32> to vector<8x16xf32>
    %174 = vector.broadcast %171 : vector<1x16xf32> to vector<8x16xf32>
    %175 = arith.mulf %173, %174 : vector<8x16xf32>
    %176 = arith.addf %170, %175 : vector<8x16xf32>
    %c5 = arith.constant 5 : index
    %c0_80 = arith.constant 0 : index
    %177 = vector.load %arg8[%c5, %c0_80] : memref<8x20xf32, #tpu.memory_space<vmem>>, vector<1x16xf32>
    %178 = vector.extract_strided_slice %146 {offsets = [0, 5], sizes = [8, 1], strides = [1, 1]} : vector<8x8xf32> to vector<8x1xf32>
    %179 = vector.broadcast %178 : vector<8x1xf32> to vector<8x16xf32>
    %180 = vector.broadcast %177 : vector<1x16xf32> to vector<8x16xf32>
    %181 = arith.mulf %179, %180 : vector<8x16xf32>
    %182 = arith.addf %176, %181 : vector<8x16xf32>
    %c6 = arith.constant 6 : index
    %c0_81 = arith.constant 0 : index
    %183 = vector.load %arg8[%c6, %c0_81] : memref<8x20xf32, #tpu.memory_space<vmem>>, vector<1x16xf32>
    %184 = vector.extract_strided_slice %146 {offsets = [0, 6], sizes = [8, 1], strides = [1, 1]} : vector<8x8xf32> to vector<8x1xf32>
    %185 = vector.broadcast %184 : vector<8x1xf32> to vector<8x16xf32>
    %186 = vector.broadcast %183 : vector<1x16xf32> to vector<8x16xf32>
    %187 = arith.mulf %185, %186 : vector<8x16xf32>
    %188 = arith.addf %182, %187 : vector<8x16xf32>
    %c7 = arith.constant 7 : index
    %c0_82 = arith.constant 0 : index
    %189 = vector.load %arg8[%c7, %c0_82] : memref<8x20xf32, #tpu.memory_space<vmem>>, vector<1x16xf32>
    %190 = vector.extract_strided_slice %146 {offsets = [0, 7], sizes = [8, 1], strides = [1, 1]} : vector<8x8xf32> to vector<8x1xf32>
    %191 = vector.broadcast %190 : vector<8x1xf32> to vector<8x16xf32>
    %192 = vector.broadcast %189 : vector<1x16xf32> to vector<8x16xf32>
    %193 = arith.mulf %191, %192 : vector<8x16xf32>
    %194 = arith.addf %188, %193 : vector<8x16xf32>
    %c1_83 = arith.constant 1 : index
    %c0_84 = arith.constant 0 : index
    %c0_85 = arith.constant 0 : index
    %195 = vector.load %arg4[%c1_83, %c0_84, %c0_85] : memref<5x8x8xf32, #tpu.memory_space<vmem>>, vector<1x8x8xf32>
    %196 = vector.shape_cast %195 : vector<1x8x8xf32> to vector<8x8xf32>
    %c0_86 = arith.constant 0 : index
    %c1_87 = arith.constant 1 : index
    %197 = vector.load %arg8[%c0_86, %c1_87] : memref<8x20xf32, #tpu.memory_space<vmem>>, vector<1x16xf32>
    %198 = vector.extract_strided_slice %196 {offsets = [0, 0], sizes = [8, 1], strides = [1, 1]} : vector<8x8xf32> to vector<8x1xf32>
    %199 = vector.broadcast %198 : vector<8x1xf32> to vector<8x16xf32>
    %200 = vector.broadcast %197 : vector<1x16xf32> to vector<8x16xf32>
    %201 = arith.mulf %199, %200 : vector<8x16xf32>
    %202 = arith.addf %194, %201 : vector<8x16xf32>
    %c1_88 = arith.constant 1 : index
    %c1_89 = arith.constant 1 : index
    %203 = vector.load %arg8[%c1_88, %c1_89] : memref<8x20xf32, #tpu.memory_space<vmem>>, vector<1x16xf32>
    %204 = vector.extract_strided_slice %196 {offsets = [0, 1], sizes = [8, 1], strides = [1, 1]} : vector<8x8xf32> to vector<8x1xf32>
    %205 = vector.broadcast %204 : vector<8x1xf32> to vector<8x16xf32>
    %206 = vector.broadcast %203 : vector<1x16xf32> to vector<8x16xf32>
    %207 = arith.mulf %205, %206 : vector<8x16xf32>
    %208 = arith.addf %202, %207 : vector<8x16xf32>
    %c2_90 = arith.constant 2 : index
    %c1_91 = arith.constant 1 : index
    %209 = vector.load %arg8[%c2_90, %c1_91] : memref<8x20xf32, #tpu.memory_space<vmem>>, vector<1x16xf32>
    %210 = vector.extract_strided_slice %196 {offsets = [0, 2], sizes = [8, 1], strides = [1, 1]} : vector<8x8xf32> to vector<8x1xf32>
    %211 = vector.broadcast %210 : vector<8x1xf32> to vector<8x16xf32>
    %212 = vector.broadcast %209 : vector<1x16xf32> to vector<8x16xf32>
    %213 = arith.mulf %211, %212 : vector<8x16xf32>
    %214 = arith.addf %208, %213 : vector<8x16xf32>
    %c3_92 = arith.constant 3 : index
    %c1_93 = arith.constant 1 : index
    %215 = vector.load %arg8[%c3_92, %c1_93] : memref<8x20xf32, #tpu.memory_space<vmem>>, vector<1x16xf32>
    %216 = vector.extract_strided_slice %196 {offsets = [0, 3], sizes = [8, 1], strides = [1, 1]} : vector<8x8xf32> to vector<8x1xf32>
    %217 = vector.broadcast %216 : vector<8x1xf32> to vector<8x16xf32>
    %218 = vector.broadcast %215 : vector<1x16xf32> to vector<8x16xf32>
    %219 = arith.mulf %217, %218 : vector<8x16xf32>
    %220 = arith.addf %214, %219 : vector<8x16xf32>
    %c4_94 = arith.constant 4 : index
    %c1_95 = arith.constant 1 : index
    %221 = vector.load %arg8[%c4_94, %c1_95] : memref<8x20xf32, #tpu.memory_space<vmem>>, vector<1x16xf32>
    %222 = vector.extract_strided_slice %196 {offsets = [0, 4], sizes = [8, 1], strides = [1, 1]} : vector<8x8xf32> to vector<8x1xf32>
    %223 = vector.broadcast %222 : vector<8x1xf32> to vector<8x16xf32>
    %224 = vector.broadcast %221 : vector<1x16xf32> to vector<8x16xf32>
    %225 = arith.mulf %223, %224 : vector<8x16xf32>
    %226 = arith.addf %220, %225 : vector<8x16xf32>
    %c5_96 = arith.constant 5 : index
    %c1_97 = arith.constant 1 : index
    %227 = vector.load %arg8[%c5_96, %c1_97] : memref<8x20xf32, #tpu.memory_space<vmem>>, vector<1x16xf32>
    %228 = vector.extract_strided_slice %196 {offsets = [0, 5], sizes = [8, 1], strides = [1, 1]} : vector<8x8xf32> to vector<8x1xf32>
    %229 = vector.broadcast %228 : vector<8x1xf32> to vector<8x16xf32>
    %230 = vector.broadcast %227 : vector<1x16xf32> to vector<8x16xf32>
    %231 = arith.mulf %229, %230 : vector<8x16xf32>
    %232 = arith.addf %226, %231 : vector<8x16xf32>
    %c6_98 = arith.constant 6 : index
    %c1_99 = arith.constant 1 : index
    %233 = vector.load %arg8[%c6_98, %c1_99] : memref<8x20xf32, #tpu.memory_space<vmem>>, vector<1x16xf32>
    %234 = vector.extract_strided_slice %196 {offsets = [0, 6], sizes = [8, 1], strides = [1, 1]} : vector<8x8xf32> to vector<8x1xf32>
    %235 = vector.broadcast %234 : vector<8x1xf32> to vector<8x16xf32>
    %236 = vector.broadcast %233 : vector<1x16xf32> to vector<8x16xf32>
    %237 = arith.mulf %235, %236 : vector<8x16xf32>
    %238 = arith.addf %232, %237 : vector<8x16xf32>
    %c7_100 = arith.constant 7 : index
    %c1_101 = arith.constant 1 : index
    %239 = vector.load %arg8[%c7_100, %c1_101] : memref<8x20xf32, #tpu.memory_space<vmem>>, vector<1x16xf32>
    %240 = vector.extract_strided_slice %196 {offsets = [0, 7], sizes = [8, 1], strides = [1, 1]} : vector<8x8xf32> to vector<8x1xf32>
    %241 = vector.broadcast %240 : vector<8x1xf32> to vector<8x16xf32>
    %242 = vector.broadcast %239 : vector<1x16xf32> to vector<8x16xf32>
    %243 = arith.mulf %241, %242 : vector<8x16xf32>
    %244 = arith.addf %238, %243 : vector<8x16xf32>
    %c2_102 = arith.constant 2 : index
    %c0_103 = arith.constant 0 : index
    %c0_104 = arith.constant 0 : index
    %245 = vector.load %arg4[%c2_102, %c0_103, %c0_104] : memref<5x8x8xf32, #tpu.memory_space<vmem>>, vector<1x8x8xf32>
    %246 = vector.shape_cast %245 : vector<1x8x8xf32> to vector<8x8xf32>
    %c0_105 = arith.constant 0 : index
    %c2_106 = arith.constant 2 : index
    %247 = vector.load %arg8[%c0_105, %c2_106] : memref<8x20xf32, #tpu.memory_space<vmem>>, vector<1x16xf32>
    %248 = vector.extract_strided_slice %246 {offsets = [0, 0], sizes = [8, 1], strides = [1, 1]} : vector<8x8xf32> to vector<8x1xf32>
    %249 = vector.broadcast %248 : vector<8x1xf32> to vector<8x16xf32>
    %250 = vector.broadcast %247 : vector<1x16xf32> to vector<8x16xf32>
    %251 = arith.mulf %249, %250 : vector<8x16xf32>
    %252 = arith.addf %244, %251 : vector<8x16xf32>
    %c1_107 = arith.constant 1 : index
    %c2_108 = arith.constant 2 : index
    %253 = vector.load %arg8[%c1_107, %c2_108] : memref<8x20xf32, #tpu.memory_space<vmem>>, vector<1x16xf32>
    %254 = vector.extract_strided_slice %246 {offsets = [0, 1], sizes = [8, 1], strides = [1, 1]} : vector<8x8xf32> to vector<8x1xf32>
    %255 = vector.broadcast %254 : vector<8x1xf32> to vector<8x16xf32>
    %256 = vector.broadcast %253 : vector<1x16xf32> to vector<8x16xf32>
    %257 = arith.mulf %255, %256 : vector<8x16xf32>
    %258 = arith.addf %252, %257 : vector<8x16xf32>
    %c2_109 = arith.constant 2 : index
    %c2_110 = arith.constant 2 : index
    %259 = vector.load %arg8[%c2_109, %c2_110] : memref<8x20xf32, #tpu.memory_space<vmem>>, vector<1x16xf32>
    %260 = vector.extract_strided_slice %246 {offsets = [0, 2], sizes = [8, 1], strides = [1, 1]} : vector<8x8xf32> to vector<8x1xf32>
    %261 = vector.broadcast %260 : vector<8x1xf32> to vector<8x16xf32>
    %262 = vector.broadcast %259 : vector<1x16xf32> to vector<8x16xf32>
    %263 = arith.mulf %261, %262 : vector<8x16xf32>
    %264 = arith.addf %258, %263 : vector<8x16xf32>
    %c3_111 = arith.constant 3 : index
    %c2_112 = arith.constant 2 : index
    %265 = vector.load %arg8[%c3_111, %c2_112] : memref<8x20xf32, #tpu.memory_space<vmem>>, vector<1x16xf32>
    %266 = vector.extract_strided_slice %246 {offsets = [0, 3], sizes = [8, 1], strides = [1, 1]} : vector<8x8xf32> to vector<8x1xf32>
    %267 = vector.broadcast %266 : vector<8x1xf32> to vector<8x16xf32>
    %268 = vector.broadcast %265 : vector<1x16xf32> to vector<8x16xf32>
    %269 = arith.mulf %267, %268 : vector<8x16xf32>
    %270 = arith.addf %264, %269 : vector<8x16xf32>
    %c4_113 = arith.constant 4 : index
    %c2_114 = arith.constant 2 : index
    %271 = vector.load %arg8[%c4_113, %c2_114] : memref<8x20xf32, #tpu.memory_space<vmem>>, vector<1x16xf32>
    %272 = vector.extract_strided_slice %246 {offsets = [0, 4], sizes = [8, 1], strides = [1, 1]} : vector<8x8xf32> to vector<8x1xf32>
    %273 = vector.broadcast %272 : vector<8x1xf32> to vector<8x16xf32>
    %274 = vector.broadcast %271 : vector<1x16xf32> to vector<8x16xf32>
    %275 = arith.mulf %273, %274 : vector<8x16xf32>
    %276 = arith.addf %270, %275 : vector<8x16xf32>
    %c5_115 = arith.constant 5 : index
    %c2_116 = arith.constant 2 : index
    %277 = vector.load %arg8[%c5_115, %c2_116] : memref<8x20xf32, #tpu.memory_space<vmem>>, vector<1x16xf32>
    %278 = vector.extract_strided_slice %246 {offsets = [0, 5], sizes = [8, 1], strides = [1, 1]} : vector<8x8xf32> to vector<8x1xf32>
    %279 = vector.broadcast %278 : vector<8x1xf32> to vector<8x16xf32>
    %280 = vector.broadcast %277 : vector<1x16xf32> to vector<8x16xf32>
    %281 = arith.mulf %279, %280 : vector<8x16xf32>
    %282 = arith.addf %276, %281 : vector<8x16xf32>
    %c6_117 = arith.constant 6 : index
    %c2_118 = arith.constant 2 : index
    %283 = vector.load %arg8[%c6_117, %c2_118] : memref<8x20xf32, #tpu.memory_space<vmem>>, vector<1x16xf32>
    %284 = vector.extract_strided_slice %246 {offsets = [0, 6], sizes = [8, 1], strides = [1, 1]} : vector<8x8xf32> to vector<8x1xf32>
    %285 = vector.broadcast %284 : vector<8x1xf32> to vector<8x16xf32>
    %286 = vector.broadcast %283 : vector<1x16xf32> to vector<8x16xf32>
    %287 = arith.mulf %285, %286 : vector<8x16xf32>
    %288 = arith.addf %282, %287 : vector<8x16xf32>
    %c7_119 = arith.constant 7 : index
    %c2_120 = arith.constant 2 : index
    %289 = vector.load %arg8[%c7_119, %c2_120] : memref<8x20xf32, #tpu.memory_space<vmem>>, vector<1x16xf32>
    %290 = vector.extract_strided_slice %246 {offsets = [0, 7], sizes = [8, 1], strides = [1, 1]} : vector<8x8xf32> to vector<8x1xf32>
    %291 = vector.broadcast %290 : vector<8x1xf32> to vector<8x16xf32>
    %292 = vector.broadcast %289 : vector<1x16xf32> to vector<8x16xf32>
    %293 = arith.mulf %291, %292 : vector<8x16xf32>
    %294 = arith.addf %288, %293 : vector<8x16xf32>
    %c3_121 = arith.constant 3 : index
    %c0_122 = arith.constant 0 : index
    %c0_123 = arith.constant 0 : index
    %295 = vector.load %arg4[%c3_121, %c0_122, %c0_123] : memref<5x8x8xf32, #tpu.memory_space<vmem>>, vector<1x8x8xf32>
    %296 = vector.shape_cast %295 : vector<1x8x8xf32> to vector<8x8xf32>
    %c0_124 = arith.constant 0 : index
    %c3_125 = arith.constant 3 : index
    %297 = vector.load %arg8[%c0_124, %c3_125] : memref<8x20xf32, #tpu.memory_space<vmem>>, vector<1x16xf32>
    %298 = vector.extract_strided_slice %296 {offsets = [0, 0], sizes = [8, 1], strides = [1, 1]} : vector<8x8xf32> to vector<8x1xf32>
    %299 = vector.broadcast %298 : vector<8x1xf32> to vector<8x16xf32>
    %300 = vector.broadcast %297 : vector<1x16xf32> to vector<8x16xf32>
    %301 = arith.mulf %299, %300 : vector<8x16xf32>
    %302 = arith.addf %294, %301 : vector<8x16xf32>
    %c1_126 = arith.constant 1 : index
    %c3_127 = arith.constant 3 : index
    %303 = vector.load %arg8[%c1_126, %c3_127] : memref<8x20xf32, #tpu.memory_space<vmem>>, vector<1x16xf32>
    %304 = vector.extract_strided_slice %296 {offsets = [0, 1], sizes = [8, 1], strides = [1, 1]} : vector<8x8xf32> to vector<8x1xf32>
    %305 = vector.broadcast %304 : vector<8x1xf32> to vector<8x16xf32>
    %306 = vector.broadcast %303 : vector<1x16xf32> to vector<8x16xf32>
    %307 = arith.mulf %305, %306 : vector<8x16xf32>
    %308 = arith.addf %302, %307 : vector<8x16xf32>
    %c2_128 = arith.constant 2 : index
    %c3_129 = arith.constant 3 : index
    %309 = vector.load %arg8[%c2_128, %c3_129] : memref<8x20xf32, #tpu.memory_space<vmem>>, vector<1x16xf32>
    %310 = vector.extract_strided_slice %296 {offsets = [0, 2], sizes = [8, 1], strides = [1, 1]} : vector<8x8xf32> to vector<8x1xf32>
    %311 = vector.broadcast %310 : vector<8x1xf32> to vector<8x16xf32>
    %312 = vector.broadcast %309 : vector<1x16xf32> to vector<8x16xf32>
    %313 = arith.mulf %311, %312 : vector<8x16xf32>
    %314 = arith.addf %308, %313 : vector<8x16xf32>
    %c3_130 = arith.constant 3 : index
    %c3_131 = arith.constant 3 : index
    %315 = vector.load %arg8[%c3_130, %c3_131] : memref<8x20xf32, #tpu.memory_space<vmem>>, vector<1x16xf32>
    %316 = vector.extract_strided_slice %296 {offsets = [0, 3], sizes = [8, 1], strides = [1, 1]} : vector<8x8xf32> to vector<8x1xf32>
    %317 = vector.broadcast %316 : vector<8x1xf32> to vector<8x16xf32>
    %318 = vector.broadcast %315 : vector<1x16xf32> to vector<8x16xf32>
    %319 = arith.mulf %317, %318 : vector<8x16xf32>
    %320 = arith.addf %314, %319 : vector<8x16xf32>
    %c4_132 = arith.constant 4 : index
    %c3_133 = arith.constant 3 : index
    %321 = vector.load %arg8[%c4_132, %c3_133] : memref<8x20xf32, #tpu.memory_space<vmem>>, vector<1x16xf32>
    %322 = vector.extract_strided_slice %296 {offsets = [0, 4], sizes = [8, 1], strides = [1, 1]} : vector<8x8xf32> to vector<8x1xf32>
    %323 = vector.broadcast %322 : vector<8x1xf32> to vector<8x16xf32>
    %324 = vector.broadcast %321 : vector<1x16xf32> to vector<8x16xf32>
    %325 = arith.mulf %323, %324 : vector<8x16xf32>
    %326 = arith.addf %320, %325 : vector<8x16xf32>
    %c5_134 = arith.constant 5 : index
    %c3_135 = arith.constant 3 : index
    %327 = vector.load %arg8[%c5_134, %c3_135] : memref<8x20xf32, #tpu.memory_space<vmem>>, vector<1x16xf32>
    %328 = vector.extract_strided_slice %296 {offsets = [0, 5], sizes = [8, 1], strides = [1, 1]} : vector<8x8xf32> to vector<8x1xf32>
    %329 = vector.broadcast %328 : vector<8x1xf32> to vector<8x16xf32>
    %330 = vector.broadcast %327 : vector<1x16xf32> to vector<8x16xf32>
    %331 = arith.mulf %329, %330 : vector<8x16xf32>
    %332 = arith.addf %326, %331 : vector<8x16xf32>
    %c6_136 = arith.constant 6 : index
    %c3_137 = arith.constant 3 : index
    %333 = vector.load %arg8[%c6_136, %c3_137] : memref<8x20xf32, #tpu.memory_space<vmem>>, vector<1x16xf32>
    %334 = vector.extract_strided_slice %296 {offsets = [0, 6], sizes = [8, 1], strides = [1, 1]} : vector<8x8xf32> to vector<8x1xf32>
    %335 = vector.broadcast %334 : vector<8x1xf32> to vector<8x16xf32>
    %336 = vector.broadcast %333 : vector<1x16xf32> to vector<8x16xf32>
    %337 = arith.mulf %335, %336 : vector<8x16xf32>
    %338 = arith.addf %332, %337 : vector<8x16xf32>
    %c7_138 = arith.constant 7 : index
    %c3_139 = arith.constant 3 : index
    %339 = vector.load %arg8[%c7_138, %c3_139] : memref<8x20xf32, #tpu.memory_space<vmem>>, vector<1x16xf32>
    %340 = vector.extract_strided_slice %296 {offsets = [0, 7], sizes = [8, 1], strides = [1, 1]} : vector<8x8xf32> to vector<8x1xf32>
    %341 = vector.broadcast %340 : vector<8x1xf32> to vector<8x16xf32>
    %342 = vector.broadcast %339 : vector<1x16xf32> to vector<8x16xf32>
    %343 = arith.mulf %341, %342 : vector<8x16xf32>
    %344 = arith.addf %338, %343 : vector<8x16xf32>
    %c4_140 = arith.constant 4 : index
    %c0_141 = arith.constant 0 : index
    %c0_142 = arith.constant 0 : index
    %345 = vector.load %arg4[%c4_140, %c0_141, %c0_142] : memref<5x8x8xf32, #tpu.memory_space<vmem>>, vector<1x8x8xf32>
    %346 = vector.shape_cast %345 : vector<1x8x8xf32> to vector<8x8xf32>
    %c0_143 = arith.constant 0 : index
    %c4_144 = arith.constant 4 : index
    %347 = vector.load %arg8[%c0_143, %c4_144] : memref<8x20xf32, #tpu.memory_space<vmem>>, vector<1x16xf32>
    %348 = vector.extract_strided_slice %346 {offsets = [0, 0], sizes = [8, 1], strides = [1, 1]} : vector<8x8xf32> to vector<8x1xf32>
    %349 = vector.broadcast %348 : vector<8x1xf32> to vector<8x16xf32>
    %350 = vector.broadcast %347 : vector<1x16xf32> to vector<8x16xf32>
    %351 = arith.mulf %349, %350 : vector<8x16xf32>
    %352 = arith.addf %344, %351 : vector<8x16xf32>
    %c1_145 = arith.constant 1 : index
    %c4_146 = arith.constant 4 : index
    %353 = vector.load %arg8[%c1_145, %c4_146] : memref<8x20xf32, #tpu.memory_space<vmem>>, vector<1x16xf32>
    %354 = vector.extract_strided_slice %346 {offsets = [0, 1], sizes = [8, 1], strides = [1, 1]} : vector<8x8xf32> to vector<8x1xf32>
    %355 = vector.broadcast %354 : vector<8x1xf32> to vector<8x16xf32>
    %356 = vector.broadcast %353 : vector<1x16xf32> to vector<8x16xf32>
    %357 = arith.mulf %355, %356 : vector<8x16xf32>
    %358 = arith.addf %352, %357 : vector<8x16xf32>
    %c2_147 = arith.constant 2 : index
    %c4_148 = arith.constant 4 : index
    %359 = vector.load %arg8[%c2_147, %c4_148] : memref<8x20xf32, #tpu.memory_space<vmem>>, vector<1x16xf32>
    %360 = vector.extract_strided_slice %346 {offsets = [0, 2], sizes = [8, 1], strides = [1, 1]} : vector<8x8xf32> to vector<8x1xf32>
    %361 = vector.broadcast %360 : vector<8x1xf32> to vector<8x16xf32>
    %362 = vector.broadcast %359 : vector<1x16xf32> to vector<8x16xf32>
    %363 = arith.mulf %361, %362 : vector<8x16xf32>
    %364 = arith.addf %358, %363 : vector<8x16xf32>
    %c3_149 = arith.constant 3 : index
    %c4_150 = arith.constant 4 : index
    %365 = vector.load %arg8[%c3_149, %c4_150] : memref<8x20xf32, #tpu.memory_space<vmem>>, vector<1x16xf32>
    %366 = vector.extract_strided_slice %346 {offsets = [0, 3], sizes = [8, 1], strides = [1, 1]} : vector<8x8xf32> to vector<8x1xf32>
    %367 = vector.broadcast %366 : vector<8x1xf32> to vector<8x16xf32>
    %368 = vector.broadcast %365 : vector<1x16xf32> to vector<8x16xf32>
    %369 = arith.mulf %367, %368 : vector<8x16xf32>
    %370 = arith.addf %364, %369 : vector<8x16xf32>
    %c4_151 = arith.constant 4 : index
    %c4_152 = arith.constant 4 : index
    %371 = vector.load %arg8[%c4_151, %c4_152] : memref<8x20xf32, #tpu.memory_space<vmem>>, vector<1x16xf32>
    %372 = vector.extract_strided_slice %346 {offsets = [0, 4], sizes = [8, 1], strides = [1, 1]} : vector<8x8xf32> to vector<8x1xf32>
    %373 = vector.broadcast %372 : vector<8x1xf32> to vector<8x16xf32>
    %374 = vector.broadcast %371 : vector<1x16xf32> to vector<8x16xf32>
    %375 = arith.mulf %373, %374 : vector<8x16xf32>
    %376 = arith.addf %370, %375 : vector<8x16xf32>
    %c5_153 = arith.constant 5 : index
    %c4_154 = arith.constant 4 : index
    %377 = vector.load %arg8[%c5_153, %c4_154] : memref<8x20xf32, #tpu.memory_space<vmem>>, vector<1x16xf32>
    %378 = vector.extract_strided_slice %346 {offsets = [0, 5], sizes = [8, 1], strides = [1, 1]} : vector<8x8xf32> to vector<8x1xf32>
    %379 = vector.broadcast %378 : vector<8x1xf32> to vector<8x16xf32>
    %380 = vector.broadcast %377 : vector<1x16xf32> to vector<8x16xf32>
    %381 = arith.mulf %379, %380 : vector<8x16xf32>
    %382 = arith.addf %376, %381 : vector<8x16xf32>
    %c6_155 = arith.constant 6 : index
    %c4_156 = arith.constant 4 : index
    %383 = vector.load %arg8[%c6_155, %c4_156] : memref<8x20xf32, #tpu.memory_space<vmem>>, vector<1x16xf32>
    %384 = vector.extract_strided_slice %346 {offsets = [0, 6], sizes = [8, 1], strides = [1, 1]} : vector<8x8xf32> to vector<8x1xf32>
    %385 = vector.broadcast %384 : vector<8x1xf32> to vector<8x16xf32>
    %386 = vector.broadcast %383 : vector<1x16xf32> to vector<8x16xf32>
    %387 = arith.mulf %385, %386 : vector<8x16xf32>
    %388 = arith.addf %382, %387 : vector<8x16xf32>
    %c7_157 = arith.constant 7 : index
    %c4_158 = arith.constant 4 : index
    %389 = vector.load %arg8[%c7_157, %c4_158] : memref<8x20xf32, #tpu.memory_space<vmem>>, vector<1x16xf32>
    %390 = vector.extract_strided_slice %346 {offsets = [0, 7], sizes = [8, 1], strides = [1, 1]} : vector<8x8xf32> to vector<8x1xf32>
    %391 = vector.broadcast %390 : vector<8x1xf32> to vector<8x16xf32>
    %392 = vector.broadcast %389 : vector<1x16xf32> to vector<8x16xf32>
    %393 = arith.mulf %391, %392 : vector<8x16xf32>
    %394 = arith.addf %388, %393 : vector<8x16xf32>
    %c0_159 = arith.constant 0 : index
    %c0_160 = arith.constant 0 : index
    %395 = vector.load %arg5[%c0_159, %c0_160] : memref<8x1xf32, #tpu.memory_space<vmem>>, vector<8x1xf32>
    %396 = vector.broadcast %395 : vector<8x1xf32> to vector<8x16xf32>
    %397 = arith.addf %394, %396 : vector<8x16xf32>
    %cst_161 = arith.constant 0.000000e+00 : f32
    %398 = vector.broadcast %cst_161 : f32 to vector<8x16xf32>
    %399 = arith.maximumf %397, %398 : vector<8x16xf32>
    %c0_162 = arith.constant 0 : index
    %c0_163 = arith.constant 0 : index
    %c0_164 = arith.constant 0 : index
    %400 = vector.load %arg7[%c0_162, %c0_163, %c0_164] : memref<1x8x16xf32, #tpu.memory_space<vmem>>, vector<1x8x16xf32>
    %401 = vector.shape_cast %400 : vector<1x8x16xf32> to vector<8x16xf32>
    %402 = vector.shape_cast %399 : vector<8x16xf32> to vector<1x8x16xf32>
    tpu.vector_store %arg7[%c0_162, %c0_163, %c0_164], %402 {strides = array<i32>} : memref<1x8x16xf32, #tpu.memory_space<vmem>>, vector<1x8x16xf32>,
    %403 = tpu.iota {dimensions = array<i32: 0>} : vector<16x8xi32>
    %404 = tpu.iota {dimensions = array<i32: 1>} : vector<16x8xi32>
    %c2_i32 = arith.constant 2 : i32
    %405 = vector.broadcast %c2_i32 : i32 to vector<16x8xi32>
    %406 = arith.muli %405, %404 : vector<16x8xi32>
    %407 = arith.cmpi eq, %403, %406 : vector<16x8xi32>
    %408 = arith.extui %407 : vector<16x8xi1> to vector<16x8xi32>
    %409 = arith.sitofp %408 : vector<16x8xi32> to vector<16x8xf32>
    %c2_i32_165 = arith.constant 2 : i32
    %410 = vector.broadcast %c2_i32_165 : i32 to vector<16x8xi32>
    %411 = arith.muli %410, %404 : vector<16x8xi32>
    %c1_i32 = arith.constant 1 : i32
    %412 = vector.broadcast %c1_i32 : i32 to vector<16x8xi32>
    %413 = arith.addi %411, %412 : vector<16x8xi32>
    %414 = arith.cmpi eq, %403, %413 : vector<16x8xi32>
    %415 = arith.extui %414 : vector<16x8xi1> to vector<16x8xi32>
    %416 = arith.sitofp %415 : vector<16x8xi32> to vector<16x8xf32>
    %cst_166 = arith.constant dense<0.000000e+00> : vector<8x8xf32>
    %417 = tpu.matmul %399, %409, %cst_166 {dimension_numbers = #tpu.dot_dimension_numbers<[1], [0], [0], [1], [0, 0, 1, 1], [], []>} : vector<8x16xf32>, vector<16x8xf32>, vector<8x8xf32> -> vector<8x8xf32>
    %cst_167 = arith.constant dense<0.000000e+00> : vector<8x8xf32>
    %418 = tpu.matmul %399, %416, %cst_167 {dimension_numbers = #tpu.dot_dimension_numbers<[1], [0], [0], [1], [0, 0, 1, 1], [], []>} : vector<8x16xf32>, vector<16x8xf32>, vector<8x8xf32> -> vector<8x8xf32>
    %419 = arith.maximumf %417, %418 : vector<8x8xf32>
    %c0_168 = arith.constant 0 : index
    %c0_169 = arith.constant 0 : index
    %c0_170 = arith.constant 0 : index
    %420 = vector.load %arg6[%c0_168, %c0_169, %c0_170] : memref<1x8x8xf32, #tpu.memory_space<vmem>>, vector<1x8x8xf32>
    %421 = vector.shape_cast %420 : vector<1x8x8xf32> to vector<8x8xf32>
    %422 = vector.shape_cast %419 : vector<8x8xf32> to vector<1x8x8xf32>
    tpu.vector_store %arg6[%c0_168, %c0_169, %c0_170], %422 {strides = array<i32>} : memref<1x8x8xf32, #tpu.memory_space<vmem>>, vector<1x8x8xf32>,
    return
  }
  func.func @transform_0(%arg0: i32) -> (i32, i32, i32) {
    %c0_i32 = arith.constant 0 : i32
    %c0_i32_0 = arith.constant 0 : i32
    %c0_i32_1 = arith.constant 0 : i32
    return %arg0, %c0_i32, %c0_i32_0 : i32, i32, i32
  }
  func.func @transform_1(%arg0: i32) -> (i32, i32, i32) {
    %c0_i32 = arith.constant 0 : i32
    %c0_i32_0 = arith.constant 0 : i32
    %c0_i32_1 = arith.constant 0 : i32
    %c0_i32_2 = arith.constant 0 : i32
    return %c0_i32, %c0_i32_0, %c0_i32_1 : i32, i32, i32
  }
  func.func @transform_2(%arg0: i32) -> (i32, i32) {
    %c0_i32 = arith.constant 0 : i32
    %c0_i32_0 = arith.constant 0 : i32
    %c0_i32_1 = arith.constant 0 : i32
    return %c0_i32, %c0_i32_0 : i32, i32
  }
  func.func @transform_3(%arg0: i32) -> (i32, i32, i32) {
    %c0_i32 = arith.constant 0 : i32
    %c0_i32_0 = arith.constant 0 : i32
    %c0_i32_1 = arith.constant 0 : i32
    %c0_i32_2 = arith.constant 0 : i32
    return %c0_i32, %c0_i32_0, %c0_i32_1 : i32, i32, i32
  }
  func.func @transform_4(%arg0: i32) -> (i32, i32) {
    %c0_i32 = arith.constant 0 : i32
    %c0_i32_0 = arith.constant 0 : i32
    %c0_i32_1 = arith.constant 0 : i32
    return %c0_i32, %c0_i32_0 : i32, i32
  }
  func.func @transform_5(%arg0: i32) -> (i32, i32, i32) {
    %c0_i32 = arith.constant 0 : i32
    %c0_i32_0 = arith.constant 0 : i32
    %c0_i32_1 = arith.constant 0 : i32
    return %arg0, %c0_i32, %c0_i32_0 : i32, i32, i32
  }
  func.func @transform_6(%arg0: i32) -> (i32, i32, i32) {
    %c0_i32 = arith.constant 0 : i32
    %c0_i32_0 = arith.constant 0 : i32
    %c0_i32_1 = arith.constant 0 : i32
    return %arg0, %c0_i32, %c0_i32_0 : i32, i32, i32
  }
}

</mosaic_0001>

<bundles_post_ra>
// kernel: tpu_custom_call.1
= control target key start
LH: loop header
LB: loop body
LE: loop exit
PB: predicated region body
PF: predicated region fallthrough
CT: control target
= control target key end

     0   :  { %s1766_s0 = inlined_call_operand.vmem [shape: f32[2,4,16], index: 0, kind: input, shape index: {}]   ;;  %s1767_s1 = inlined_call_operand.vmem [shape: f32[5,8,4], index: 1, kind: input, shape index: {}]   ;;  %s1768_s2 = inlined_call_operand.vmem [shape: f32[8,1], index: 2, kind: input, shape index: {}]   ;;  %s1769_s3 = inlined_call_operand.vmem [shape: f32[5,8,8], index: 3, kind: input, shape index: {}]   ;;  %s1770_s4 = inlined_call_operand.vmem [shape: f32[8,1], index: 4, kind: input, shape index: {}]   ;;  %s1771_s5 = inlined_call_operand.hbm [shape: f32[2,8,8], index: 5, kind: output, shape index: {0}]   ;;  %s1772_s6 = inlined_call_operand.hbm [shape: f32[2,8,16], index: 6, kind: output, shape index: {1}]  }
   0x1   :  { %1774 = sst [smem:[#allocation9_spill]] %s1766_s0 }
   0x2   :  { %12 = vsyncpa [#allocation4], 0 }
   0x3   :  { %14 = vsyncpa [#allocation4 + $0x1], 0 }
   0x4   :  { %15 = vsyncpa [#allocation6], 0 }
   0x5   :  { %17 = vsyncpa [#allocation6 + $0x1], 0  ;;  %s1390_s21 = smov 0   ;;  %s1392_s22 = smov 0  }
   0x6   :  { %s1394_s23 = smov 0   ;;  %s1396_s24 = smov 0  }
   0x7 LB: > { %s1411_s25 = sadd.s32 4294967295, %s1338_s24   ;;  %s1088_s26 = sadd.s32 4294967294, %s1338_s24   ;;  %s1338_s24 = sphi %s1396_s24, %s1782_s24   ;;  %s1334_s23 = sphi %s1394_s23, %s1781_s23   ;;  %s1330_s22 = sphi %s1392_s22, %s1780_s22   ;;  %s1326_s21 = sphi %s1390_s21, %s1779_s21  }
   0x8   : > { %s1415_s27 = sadd.s32 1, %s1338_s24   ;;  %s140_s28 = sadd.s32 1, %s1334_s23 }
   0x9   : > { %s137_s29 = ssub.s32 %s1338_s24, %s1415_s27  ;;  %p150_p0 = scmp.ne.s32.totalorder %s1334_s23, %s1330_s22 }
   0xa   : > { %p138_p1 = scmp.eq.s32.totalorder %s137_s29, 0  ;;  %p151_p2 = scmp.eq.s32.totalorder %s1411_s25, 1 }
   0xb   : > { %p156_p3 = scmp.ne.s32.totalorder %s1330_s22, %s1326_s21  ;;  %p157_p4 = scmp.eq.s32.totalorder %s1088_s26, 1 }
   0xc   : > { %s1426_s30 = scalar_select %p138_p1, %s1334_s23, %s140_s28  }
   0xd   : > { %p1428_p5 = por %p151_p2, %p150_p0  ;;  %p1432_p6 = por %p157_p4, %p156_p3 }
   0xe   : > { %p1091_p7 = scmp.ge.s32.totalorder %s1338_s24, 1  ;;  %p220_p8 = scmp.lt.s32.totalorder %s1338_s24, 3 }
  0x10   : > { %p221_p9 = pnand %p1091_p7, %p220_p8 }
  0x11   : > { %p254_p10 = scmp.lt.s32.totalorder (!%p221_p9), %s1411_s25, 1  ;;  %s1777_s0 = sld [smem:[#allocation9_spill]] (!%p221_p9) }
  0x12   : > { %224 = sbr.rel (%p221_p9) target bundleno = 811 (0x32b), region = 40  ;;  %s1343_s16 = smov (!%p221_p9), 2  }
  0x13   : > { %s1350_s14 = smov (!%p221_p9), 127   ;;  %s1352_s17 = smov (!%p221_p9), 125  }
  0x14   : > { %s1353_s18 = smov (!%p221_p9), 124   ;;  %s1713_s13 = sand.u32 (!%p221_p9), 1, %s1330_s22  }
  0x15   : > { %s967_s29 = scalar_lea.sflag (!%p221_p9), [#allocation6], %s1713_s13 }
  0x17   : > { %v267_v0 = vld [vmem:[%s1767_s1] sm:$0xff]  ;;  %v1340_v1 = vmov 3   ;;  %v1341_v2 = vmov 1   ;;  %s255_s11 = scalar_select %p254_p10, %s1411_s25, 1  ;;  %v1342_v3 = vmov 0   ;;  %v1095_v5 = vld [vmem:[%s1767_s1 + $0x8] sm:$0xff] }
  0x18   : > { %1181 = vset.pattern.permute.xlu2 %v1340_v1  ;;  %1179 = vset.pattern.permute.xlu1 %v1341_v2  ;;  %v1344_v6 = vmov 2   ;;  %v1097_v7 = vld [vmem:[%s1767_s1 + $0x18] sm:$0xff]  ;;  %v1096_v8 = vld [vmem:[%s1767_s1 + $0x10] sm:$0xff]  ;;  %v1098_v9 = vld [vmem:[%s1767_s1 + $0x20] sm:$0xff]  ;;  %vm259_vm0 = vcmask 162816   ;;  %v1345_v12 = vmov 0.0  }
  0x19   : > { %295 = vperm.xlu2 %1181, %v267_v0   ;;  %279 = vperm.xlu1 %1179, %v267_v0   ;;  %s1094_s12 = sshll.u32 %s255_s11, 2  ;;  %v1477_v10 = vld [vmem:[%s1769_s3] sm:$0xff]  ;;  %260 = vst.msk [vmem:[#allocation2] sm:$0xff] %vm259_vm0, %v1345_v12  ;;  %v1346_v13 = vmov 5   ;;  %v1347_v15 = vmov 7   ;;  %v1348_v16 = vmov 4  }
  0x1a   : > { %1178 = vset.pattern.permute.xlu0 %v1342_v3  ;;  %s257_s15 = scalar_lea.vmem %s1777_s0, %s1094_s12  ;;  %v473_v11 = vld [vmem:[%s1768_s2] sm:$0xff]  ;;  %v1349_v18 = vmov 6   ;;  %vm265_vm1 = vcmask 142352   ;;  %v1516_v56 = vld [vmem:[%s1769_s3 + $0x8] sm:$0xff]  ;;  %vm486_vm2 = vcmask 146448   ;;  %vm894_vm7 = vcmask 130048  }
  0x1b   : > { %v258_v4 = vld [vmem:[%s257_s15] sm:$0xf]  ;;  %s1351_s15 = smov 126  }
  0x1c   : > { %262 = vrot.lane.b32.xlu0 %v258_v4, %s1343_s16 }
  0x21   : > { %1182 = vset.pattern.permute.xlu2 %v1342_v3  ;;  %1180 = vset.pattern.permute.xlu1 %v1344_v6 }
  0x22   : > { %305 = vperm.xlu2 %1182, %v1095_v5   ;;  %287 = vperm.xlu1 %1180, %v267_v0  }
  0x24   : > { %271 = vperm.xlu0 %1178, %v267_v0  }
  0x2a   : > { %1183 = vset.pattern.permute.xlu2 %v1341_v2  ;;  %325 = vperm.xlu1 %1180, %v1095_v5  }
  0x2b   : > { %315 = vperm.xlu2 %1183, %v1095_v5  }
  0x2c   : > { %1188 = vset.pattern.permute.xlu0 %v1344_v6 }
  0x2d   : > { %411 = vperm.xlu0 %1188, %v1097_v7  }
  0x32   : > { %368 = vperm.xlu1 %1180, %v1096_v8  }
  0x33   : > { %1184 = vset.pattern.permute.xlu2 %v1342_v3 }
  0x34   : > { %348 = vperm.xlu2 %1184, %v1096_v8  }
  0x35   : > { %1189 = vset.pattern.permute.xlu0 %v1340_v1 }
  0x36   : > { %335 = vperm.xlu0 %1189, %v1095_v5   ;;  %v1100_v5 = vld [vmem:[%s1769_s3 + $0x10] sm:$0xff] }
  0x3a   : > { %1187 = vset.pattern.permute.xlu1 %v1341_v2 }
  0x3b   : > { %401 = vperm.xlu1 %1187, %v1097_v7  }
  0x3c   : > { %1185 = vset.pattern.permute.xlu2 %v1341_v2 }
  0x3d   : > { %358 = vperm.xlu2 %1185, %v1096_v8  }
  0x3e   : > { %378 = vperm.xlu0 %1189, %v1096_v8  }
  0x43   : > { %444 = vperm.xlu1 %1187, %v1098_v9  }
  0x45   : > { %1186 = vset.pattern.permute.xlu2 %v1342_v3 }
  0x46   : > { %391 = vperm.xlu2 %1186, %v1097_v7   ;;  %464 = vperm.xlu0 %1189, %v1098_v9  }
  0x4b   : > { %1194 = vset.pattern.permute.xlu1 %v1342_v3 }
  0x4c   : > { %492 = vperm.xlu1 %1194, %v1477_v10  }
  0x4e   : > { %1190 = vset.pattern.permute.xlu2 %v1340_v1  ;;  %1200 = vset.pattern.permute.xlu0 %v1347_v15 }
  0x4f   : > { %421 = vperm.xlu2 %1190, %v1097_v7   ;;  %548 = vperm.xlu0 %1200, %v1477_v10  }
  0x54   : > { %1196 = vset.pattern.permute.xlu1 %v1340_v1 }
  0x55   : > { %516 = vperm.xlu1 %1196, %v1477_v10  }
  0x57   : > { %1191 = vset.pattern.permute.xlu2 %v1342_v3 }
  0x58   : > { %434 = vperm.xlu2 %1191, %v1098_v9  }
  0x5d   : > { %1198 = vset.pattern.permute.xlu1 %v1346_v13 }
  0x5e   : > { %532 = vperm.xlu1 %1198, %v1477_v10  }
  0x60   : > { %1192 = vset.pattern.permute.xlu2 %v1344_v6 }
  0x61   : > { %454 = vperm.xlu2 %1192, %v1098_v9  }
  0x66   : > { %1201 = vset.pattern.permute.xlu1 %v1342_v3 }
  0x69   : > { %1193 = vset.pattern.permute.xlu2 %v1342_v3 }
  0x6a   : > { %476 = vperm.xlu2 %1193, %v473_v11  }
  0x72   : > { %1195 = vset.pattern.permute.xlu2 %v1341_v2 }
  0x73   : > { %v296_v14 = vpop.permute.xlu2 %295  ;;  %500 = vperm.xlu2 %1195, %v1477_v10  }
  0x7b   : > { %1197 = vset.pattern.permute.xlu2 %v1348_v16 }
  0x7c   : > { %v306_v17 = vpop.permute.xlu2 %305  ;;  %524 = vperm.xlu2 %1197, %v1477_v10  }
  0x84   : > { %1199 = vset.pattern.permute.xlu2 %v1349_v18 }
  0x85   : > { %v316_v19 = vpop.permute.xlu2 %315  ;;  %540 = vperm.xlu2 %1199, %v1477_v10  }
  0x8b   : > { %v280_v20 = vpop.permute.xlu1 %279 }
  0x8d   : > { %1204 = vset.pattern.permute.xlu2 %v1348_v16 }
  0x8e   : > { %v349_v21 = vpop.permute.xlu2 %348  ;;  %v263_v22 = vpop.permute.xlu0 %262 }
  0x8f   : > { %266 = vst.msk [vmem:[#allocation2] sm:$0xf] %vm265_vm1, %v263_v22 }
  0x94   : > { %v288_v23 = vpop.permute.xlu1 %287 }
  0x96   : > { %v1232_v25 = vld [vmem:[#allocation2 + $0x2] ss:$0 sm:$0xff]  ;;  %v272_v26 = vpop.permute.xlu0 %271  ;;  %v1233_v27 = vld [vmem:[#allocation2 + $0x1] ss:$0 sm:$0xff]  ;;  %v1234_v28 = vld [vmem:[#allocation2] ss:$0 sm:$0xff] }
  0x97   : > { %v359_v24 = vpop.permute.xlu2 %358  ;;  %v1235_v29 = vld [vmem:[#allocation2 + $0x3] ss:$0 sm:$0xff]  ;;  %v283_v30 = vmul.f32 %v1233_v27, %v280_v20  ;;  %v275_v31 = vmul.f32 %v1234_v28, %v272_v26  ;;  %v318_v32 = vmul.f32 %v1233_v27, %v316_v19  ;;  %v308_v34 = vmul.f32 %v1234_v28, %v306_v17  ;;  %v1561_v19 = vld [vmem:[%s1769_s3 + $0x18] sm:$0xff] }
  0x98   : > { %481 = vst.msk [vmem:[#allocation2] sm:$0xff] %vm259_vm0, %v1345_v12  ;;  %v291_v35 = vmul.f32 %v1232_v25, %v288_v23  ;;  %v299_v38 = vmul.f32 %v1235_v29, %v296_v14  ;;  %v361_v43 = vmul.f32 %v1233_v27, %v359_v24  ;;  %v351_v54 = vmul.f32 %v1234_v28, %v349_v21 }
  0x99   : > { %v284_v36 = vadd.f32 %v283_v30, %v275_v31  ;;  %320 = vrot.lane.b32.xlu0 %v318_v32, %s1350_s14  ;;  %310 = vrot.lane.b32.xlu1 %v308_v34, %s1350_s14 }
  0x9b   : > { %v292_v39 = vadd.f32 %v291_v35, %v284_v36 }
  0x9c   : > { %v326_v33 = vpop.permute.xlu1 %325 }
  0x9d   : > { %v328_v37 = vmul.f32 %v1232_v25, %v326_v33  ;;  %v1504_v42 = vadd.f32 %v299_v38, %v292_v39  ;;  %v1102_v38 = vld [vmem:[%s1769_s3 + $0x20] sm:$0xff] }
  0x9f   : > { %330 = vrot.lane.b32.xlu2 %v328_v37, %s1350_s14  ;;  %v412_v41 = vpop.permute.xlu0 %411 }
  0xa0   : > { %v392_v40 = vpop.permute.xlu2 %391  ;;  %v414_v60 = vmul.f32 %v1232_v25, %v412_v41 }
  0xa1   : > { %363 = vrot.lane.b32.xlu0 %v361_v43, %s1351_s15  ;;  %v394_v48 = vmul.f32 %v1234_v28, %v392_v40 }
  0xa4   : > { %v369_v44 = vpop.permute.xlu1 %368 }
  0xa5   : > { %v371_v45 = vmul.f32 %v1232_v25, %v369_v44 }
  0xa7   : > { %373 = vrot.lane.b32.xlu2 %v371_v45, %s1351_s15 }
  0xa8   : > { %v336_v47 = vpop.permute.xlu0 %335 }
  0xa9   : > { %v422_v46 = vpop.permute.xlu2 %421  ;;  %v338_v49 = vmul.f32 %v1235_v29, %v336_v47  ;;  %396 = vrot.lane.b32.xlu0 %v394_v48, %s1352_s17 }
  0xaa   : > { %v424_v61 = vmul.f32 %v1235_v29, %v422_v46 }
  0xab   : > { %340 = vrot.lane.b32.xlu1 %v338_v49, %s1350_s14 }
  0xad   : > { %v402_v50 = vpop.permute.xlu1 %401 }
  0xae   : > { %v404_v51 = vmul.f32 %v1233_v27, %v402_v50 }
  0xb0   : > { %406 = vrot.lane.b32.xlu2 %v404_v51, %s1352_s17  ;;  %v379_v55 = vpop.permute.xlu0 %378 }
  0xb1   : > { %v381_v57 = vmul.f32 %v1235_v29, %v379_v55 }
  0xb2   : > { %v435_v52 = vpop.permute.xlu2 %434 }
  0xb3   : > { %v437_v53 = vmul.f32 %v1234_v28, %v435_v52  ;;  %353 = vrot.lane.b32.xlu1 %v351_v54, %s1351_s15 }
  0xb5   : > { %439 = vrot.lane.b32.xlu0 %v437_v53, %s1353_s18  ;;  %v445_v62 = vpop.permute.xlu1 %444 }
  0xb6   : > { %v447_v63 = vmul.f32 %v1233_v27, %v445_v62 }
  0xb8   : > { %v465_v0 = vpop.permute.xlu0 %464 }
  0xb9   : > { %v467_v4 = vmul.f32 %v1235_v29, %v465_v0 }
  0xbb   : > { %v455_v58 = vpop.permute.xlu2 %454  ;;  %383 = vrot.lane.b32.xlu1 %v381_v57, %s1351_s15 }
  0xbc   : > { %v457_v59 = vmul.f32 %v1232_v25, %v455_v58 }
  0xbd   : > { %628 = vperm.xlu0 %1200, %v1516_v56  }
  0xbe   : > { %459 = vrot.lane.b32.xlu2 %v457_v59, %s1353_s18  ;;  %v1538_v7 = vpop.permute.xlu1 %492 }
  0xc1   : > { %v1566_v20 = vpop.permute.xlu0 %548 }
  0xc3   : > { %416 = vrot.lane.b32.xlu1 %v414_v60, %s1352_s17 }
  0xc4   : > { %v1542_v8 = vpop.permute.xlu2 %476 }
  0xc5   : > { %1211 = vset.pattern.permute.xlu0 %v1348_v16 }
  0xc6   : > { %598 = vperm.xlu2 %1204, %v1516_v56   ;;  %681 = vperm.xlu0 %1211, %v1100_v5  }
  0xc7   : > { %v1546_v9 = vpop.permute.xlu1 %516 }
  0xcb   : > { %426 = vrot.lane.b32.xlu1 %v424_v61, %s1352_s17 }
  0xcd   : > { %v1550_v11 = vpop.permute.xlu2 %500 }
  0xce   : > { %1206 = vset.pattern.permute.xlu2 %v1349_v18  ;;  %1216 = vset.pattern.permute.xlu0 %v1341_v2 }
  0xcf   : > { %618 = vperm.xlu2 %1206, %v1516_v56   ;;  %734 = vperm.xlu0 %1216, %v1561_v19  }
  0xd0   : > { %v1552_v12 = vpop.permute.xlu1 %532 }
  0xd3   : > { %449 = vrot.lane.b32.xlu1 %v447_v63, %s1353_s18 }
  0xd6   : > { %v1556_v14 = vpop.permute.xlu2 %524 }
  0xd7   : > { %1208 = vset.pattern.permute.xlu2 %v1341_v2  ;;  %1217 = vset.pattern.permute.xlu0 %v1344_v6 }
  0xd8   : > { %651 = vperm.xlu2 %1208, %v1100_v5   ;;  %508 = vperm.xlu0 %1217, %v1477_v10  }
  0xdb   : > { %469 = vrot.lane.b32.xlu1 %v467_v4, %s1353_s18 }
  0xdf   : > { %v1568_v21 = vpop.permute.xlu2 %540 }
  0xe0   : > { %1210 = vset.pattern.permute.xlu2 %v1340_v1 }
  0xe1   : > { %671 = vperm.xlu2 %1210, %v1100_v5  }
  0xe3   : > { %558 = vperm.xlu1 %1201, %v1516_v56  }
  0xe9   : > { %1213 = vset.pattern.permute.xlu2 %v1349_v18 }
  0xea   : > { %701 = vperm.xlu2 %1213, %v1100_v5  }
  0xeb   : > { %1202 = vset.pattern.permute.xlu1 %v1341_v2 }
  0xec   : > { %568 = vperm.xlu1 %1202, %v1516_v56  }
  0xf2   : > { %1215 = vset.pattern.permute.xlu2 %v1342_v3 }
  0xf3   : > { %724 = vperm.xlu2 %1215, %v1561_v19  }
  0xf4   : > { %1203 = vset.pattern.permute.xlu1 %v1340_v1 }
  0xf5   : > { %588 = vperm.xlu1 %1203, %v1516_v56  }
  0xf9   : > { %v331_v27 = vpop.permute.xlu2 %330 }
  0xfb   : > { %1219 = vset.pattern.permute.xlu2 %v1340_v1 }
  0xfc   : > { %754 = vperm.xlu2 %1219, %v1561_v19  }
  0xfd   : > { %1205 = vset.pattern.permute.xlu1 %v1346_v13 }
  0xfe   : > { %608 = vperm.xlu1 %1205, %v1516_v56  }
 0x101   : > { %v374_v33 = vpop.permute.xlu2 %373 }
 0x104   : > { %1221 = vset.pattern.permute.xlu2 %v1346_v13 }
 0x105   : > { %774 = vperm.xlu2 %1221, %v1561_v19  }
 0x106   : > { %1207 = vset.pattern.permute.xlu1 %v1342_v3 }
 0x107   : > { %641 = vperm.xlu1 %1207, %v1100_v5  }
 0x10a   : > { %v407_v39 = vpop.permute.xlu2 %406 }
 0x10b   : > { %v311_v17 = vpop.permute.xlu1 %310  ;;  %v321_v24 = vpop.permute.xlu0 %320 }
 0x10c   : > { %v313_v23 = vadd.f32 %v311_v17, %v1504_v42 }
 0x10d   : > { %1222 = vset.pattern.permute.xlu2 %v1347_v15 }
 0x10e   : > { %v323_v25 = vadd.f32 %v321_v24, %v313_v23  ;;  %794 = vperm.xlu2 %1222, %v1561_v19  }
 0x10f   : > { %1209 = vset.pattern.permute.xlu1 %v1344_v6 }
 0x110   : > { %661 = vperm.xlu1 %1209, %v1100_v5   ;;  %v333_v28 = vadd.f32 %v331_v27, %v323_v25 }
 0x113   : > { %v364_v10 = vpop.permute.xlu0 %363 }
 0x116   : > { %1223 = vset.pattern.permute.xlu2 %v1342_v3 }
 0x117   : > { %807 = vperm.xlu2 %1223, %v1102_v38  }
 0x118   : > { %1212 = vset.pattern.permute.xlu1 %v1346_v13  ;;  %v460_v48 = vpop.permute.xlu2 %459 }
 0x119   : > { %691 = vperm.xlu1 %1212, %v1100_v5  }
 0x11b   : > { %v397_v37 = vpop.permute.xlu0 %396 }
 0x11d   : > { %v341_v22 = vpop.permute.xlu1 %340 }
 0x11e   : > { %v343_v29 = vadd.f32 %v341_v22, %v333_v28 }
 0x11f   : > { %1226 = vset.pattern.permute.xlu2 %v1340_v1 }
 0x120   : > { %837 = vperm.xlu2 %1226, %v1102_v38  }
 0x121   : > { %1214 = vset.pattern.permute.xlu1 %v1347_v15 }
 0x122   : > { %711 = vperm.xlu1 %1214, %v1100_v5  }
 0x125   : > { %v354_v26 = vpop.permute.xlu1 %353 }
 0x126   : > { %v356_v30 = vadd.f32 %v354_v26, %v343_v29 }
 0x127   : > { %v440_v44 = vpop.permute.xlu0 %439 }
 0x128   : > { %v366_v32 = vadd.f32 %v364_v10, %v356_v30  ;;  %1227 = vset.pattern.permute.xlu2 %v1348_v16 }
 0x129   : > { %847 = vperm.xlu2 %1227, %v1102_v38  }
 0x12a   : > { %1218 = vset.pattern.permute.xlu1 %v1344_v6  ;;  %v376_v34 = vadd.f32 %v374_v33, %v366_v32 }
 0x12b   : > { %744 = vperm.xlu1 %1218, %v1561_v19  }
 0x12d   : > { %v384_v31 = vpop.permute.xlu1 %383 }
 0x12e   : > { %v386_v36 = vadd.f32 %v384_v31, %v376_v34 }
 0x12f   : > { %v1600_v53 = vpop.permute.xlu0 %628 }
 0x130   : > { %v399_v6 = vadd.f32 %v397_v37, %v386_v36 }
 0x131   : > { %1229 = vset.pattern.permute.xlu2 %v1347_v15 }
 0x132   : > { %v409_v41 = vadd.f32 %v407_v39, %v399_v6  ;;  %877 = vperm.xlu2 %1229, %v1102_v38  }
 0x133   : > { %1220 = vset.pattern.permute.xlu1 %v1348_v16 }
 0x134   : > { %764 = vperm.xlu1 %1220, %v1561_v19  }
 0x135   : > { %v417_v35 = vpop.permute.xlu1 %416 }
 0x136   : > { %v419_v42 = vadd.f32 %v417_v35, %v409_v41 }
 0x138   : > { %v1602_v55 = vpop.permute.xlu0 %681 }
 0x13c   : > { %1224 = vset.pattern.permute.xlu1 %v1341_v2 }
 0x13d   : > { %v427_v40 = vpop.permute.xlu1 %426  ;;  %817 = vperm.xlu1 %1224, %v1102_v38  }
 0x13e   : > { %v429_v43 = vadd.f32 %v427_v40, %v419_v42 }
 0x140   : > { %v442_v46 = vadd.f32 %v440_v44, %v429_v43 }
 0x145   : > { %v450_v45 = vpop.permute.xlu1 %449  ;;  %1228 = vset.pattern.permute.xlu1 %v1346_v13  ;;  %v599_v13 = vpop.permute.xlu2 %598 }
 0x146   : > { %857 = vperm.xlu1 %1228, %v1102_v38   ;;  %v452_v47 = vadd.f32 %v450_v45, %v442_v46 }
 0x148   : > { %v462_v49 = vadd.f32 %v460_v48, %v452_v47 }
 0x14d   : > { %v470_v2 = vpop.permute.xlu1 %469  ;;  %v619_v52 = vpop.permute.xlu2 %618 }
 0x14e   : > { %v472_v50 = vadd.f32 %v470_v2, %v462_v49  ;;  %1230 = vset.pattern.permute.xlu1 %v1342_v3 }
 0x150   : > { %v479_v51 = vadd.f32 %v1542_v8, %v472_v50 }
 0x152   : > { %v480_v1 = vmax.f32 %v479_v51, 0.0 }
 0x154   : > { %483 = vrot.lane.b32.xlu0 %v480_v1, %s1343_s16 }
 0x155   : > { %v559_v16 = vpop.permute.xlu1 %558  ;;  %v1604_v15 = vpop.permute.xlu2 %651 }
 0x15c   : > { %578 = vperm.xlu0 %1217, %v1516_v56   ;;  %v1606_v56 = vpop.permute.xlu0 %734 }
 0x15d   : > { %v1608_v58 = vpop.permute.xlu2 %671 }
 0x15e   : > { %v569_v54 = vpop.permute.xlu1 %568 }
 0x164   : > { %827 = vperm.xlu0 %1217, %v1102_v38   ;;  %v509_v59 = vpop.permute.xlu0 %508 }
 0x165   : > { %v1610_v60 = vpop.permute.xlu2 %701 }
 0x167   : > { %v589_v57 = vpop.permute.xlu1 %588 }
 0x16c   : > { %1225 = vset.pattern.permute.xlu0 %v1349_v18 }
 0x16d   : > { %784 = vperm.xlu0 %1225, %v1561_v19   ;;  %v725_v62 = vpop.permute.xlu2 %724 }
 0x170   : > { %v609_v18 = vpop.permute.xlu1 %608 }
 0x175   : > { %867 = vperm.xlu0 %1225, %v1102_v38   ;;  %v755_v17 = vpop.permute.xlu2 %754 }
 0x17d   : > { %1231 = vset.pattern.permute.xlu0 %v1342_v3  ;;  %v642_v3 = vpop.permute.xlu1 %641  ;;  %v775_v10 = vpop.permute.xlu2 %774 }
 0x185   : > { %v662_v63 = vpop.permute.xlu1 %661  ;;  %v795_v44 = vpop.permute.xlu2 %794 }
 0x18d   : > { %v692_v26 = vpop.permute.xlu1 %691  ;;  %v808_v50 = vpop.permute.xlu2 %807 }
 0x195   : > { %v712_v38 = vpop.permute.xlu1 %711 }
 0x19d   : > { %v745_v49 = vpop.permute.xlu1 %744 }
 0x1c6   : > { %v484_v61 = vpop.permute.xlu0 %483 }
 0x1c7   : > { %487 = vst.msk [vmem:[#allocation2] sm:$0xff] %vm486_vm2, %v484_v61 }
 0x1ce   : > { %v1612_v0 = vld [vmem:[#allocation2 + $0x4] ss:$0 sm:$0xff]  ;;  %v579_v4 = vpop.permute.xlu0 %578  ;;  %v1614_v5 = vld [vmem:[#allocation2 + $0x2] ss:$0 sm:$0xff]  ;;  %v1618_v22 = vld [vmem:[#allocation2] ss:$0 sm:$0xff] }
 0x1cf   : > { %v601_v8 = vmul.f32 %v1612_v0, %v599_v13  ;;  %v581_v19 = vmul.f32 %v1614_v5, %v579_v4  ;;  %v1621_v23 = vld [vmem:[#allocation2 + $0x1] ss:$0 sm:$0xff]  ;;  %v561_v24 = vmul.f32 %v1618_v22, %v559_v16  ;;  %v1626_v25 = vld [vmem:[#allocation2 + $0x3] ss:$0 sm:$0xff]  ;;  %v512_v28 = vmul.f32 %v1614_v5, %v509_v59  ;;  %v1638_v34 = vld [vmem:[#allocation2 + $0x5] ss:$0 sm:$0xff]  ;;  %v765_v13 = vpop.permute.xlu1 %764 }
 0x1d0   : > { %v504_v27 = vmul.f32 %v1621_v23, %v1550_v11  ;;  %v644_v29 = vmul.f32 %v1618_v22, %v642_v3  ;;  %v591_v30 = vmul.f32 %v1626_v25, %v589_v57  ;;  %v496_v31 = vmul.f32 %v1618_v22, %v1538_v7  ;;  %v1641_v11 = vld [vmem:[#allocation2 + $0x6] ss:$0 sm:$0xff]  ;;  %v1239_v39 = vld [vmem:[#allocation2 + $0x7] ss:$0 sm:$0xff] }
 0x1d1   : > { %603 = vrot.lane.b32.xlu0 %v601_v8, %s1350_s14  ;;  %583 = vrot.lane.b32.xlu1 %v581_v19, %s1350_s14  ;;  %v571_v32 = vmul.f32 %v1621_v23, %v569_v54  ;;  %v520_v35 = vmul.f32 %v1626_v25, %v1546_v9  ;;  %v528_v7 = vmul.f32 %v1612_v0, %v1556_v14 }
 0x1d2   : > { %563 = vrot.lane.b32.xlu2 %v561_v24, %s1350_s14  ;;  %v505_v33 = vadd.f32 %v504_v27, %v496_v31  ;;  %v694_v6 = vmul.f32 %v1638_v34, %v692_v26  ;;  %v621_v40 = vmul.f32 %v1641_v11, %v619_v52  ;;  %v536_v41 = vmul.f32 %v1638_v34, %v1552_v12 }
 0x1d3   : > { %v611_v43 = vmul.f32 %v1638_v34, %v609_v18  ;;  %v544_v9 = vmul.f32 %v1641_v11, %v1568_v21  ;;  %v552_v45 = vmul.f32 %v1239_v39, %v1566_v20  ;;  %v727_v12 = vmul.f32 %v1618_v22, %v725_v62 }
 0x1d4   : > { %v513_v36 = vadd.f32 %v512_v28, %v505_v33  ;;  %v631_v48 = vmul.f32 %v1239_v39, %v1600_v53  ;;  %v654_v21 = vmul.f32 %v1621_v23, %v1604_v15  ;;  %v757_v20 = vmul.f32 %v1626_v25, %v755_v17  ;;  %v838_v53 = vpop.permute.xlu2 %837 }
 0x1d5   : > { %v664_v51 = vmul.f32 %v1614_v5, %v662_v63  ;;  %v684_v1 = vmul.f32 %v1612_v0, %v1602_v55  ;;  %v674_v54 = vmul.f32 %v1626_v25, %v1608_v58  ;;  %v714_v15 = vmul.f32 %v1239_v39, %v712_v38 }
 0x1d6   : > { %v521_v37 = vadd.f32 %v520_v35, %v513_v36  ;;  %v828_v2 = vpop.permute.xlu0 %827  ;;  %v704_v18 = vmul.f32 %v1641_v11, %v1610_v60  ;;  %v747_v3 = vmul.f32 %v1614_v5, %v745_v49  ;;  %v737_v61 = vmul.f32 %v1621_v23, %v1606_v56 }
 0x1d7   : > { %v818_v55 = vpop.permute.xlu1 %817  ;;  %v777_v62 = vmul.f32 %v1638_v34, %v775_v10  ;;  %v767_v4 = vmul.f32 %v1612_v0, %v765_v13  ;;  %v810_v8 = vmul.f32 %v1618_v22, %v808_v50  ;;  %v797_v56 = vmul.f32 %v1239_v39, %v795_v44 }
 0x1d8   : > { %v529_v42 = vadd.f32 %v528_v7, %v521_v37  ;;  %v820_v57 = vmul.f32 %v1621_v23, %v818_v55  ;;  %v840_v17 = vmul.f32 %v1626_v25, %v838_v53  ;;  %v830_v23 = vmul.f32 %v1614_v5, %v828_v2  ;;  %v886_v25 = vld [vmem:[%s1770_s4] sm:$0xff] }
 0x1d9   : > { %646 = vrot.lane.b32.xlu0 %v644_v29, %s1351_s15  ;;  %593 = vrot.lane.b32.xlu1 %v591_v30, %s1350_s14  ;;  %v896_v55 = vlaneseq }
 0x1da   : > { %573 = vrot.lane.b32.xlu2 %v571_v32, %s1350_s14  ;;  %v537_v14 = vadd.f32 %v536_v41, %v529_v42 }
 0x1dc   : > { %v545_v46 = vadd.f32 %v544_v9, %v537_v14  ;;  %v848_v59 = vpop.permute.xlu2 %847 }
 0x1dd   : > { %v850_v58 = vmul.f32 %v1612_v0, %v848_v59  ;;  %v900_v59 = vand.u32 127, %v896_v55 }
 0x1de   : > { %v1658_v47 = vadd.f32 %v552_v45, %v545_v46 }
 0x1df   : > { %v785_v16 = vpop.permute.xlu0 %784  ;;  %v858_v22 = vpop.permute.xlu1 %857 }
 0x1e0   : > { %v787_v52 = vmul.f32 %v1641_v11, %v785_v16  ;;  %v860_v24 = vmul.f32 %v1638_v34, %v858_v22 }
 0x1e1   : > { %696 = vrot.lane.b32.xlu0 %v694_v6, %s1351_s15  ;;  %623 = vrot.lane.b32.xlu1 %v621_v40, %s1350_s14 }
 0x1e2   : > { %613 = vrot.lane.b32.xlu2 %v611_v43, %s1350_s14 }
 0x1e4   : > { %v878_v60 = vpop.permute.xlu2 %877 }
 0x1e5   : > { %v880_v63 = vmul.f32 %v1239_v39, %v878_v60 }
 0x1e7   : > { %v868_v19 = vpop.permute.xlu0 %867 }
 0x1e8   : > { %v870_v0 = vmul.f32 %v1641_v11, %v868_v19 }
 0x1e9   : > { %729 = vrot.lane.b32.xlu0 %v727_v12, %s1352_s17  ;;  %633 = vrot.lane.b32.xlu1 %v631_v48, %s1350_s14  ;;  %s1773_s14 = sshll.u32 %s1713_s13, 3 }
 0x1ea   : > { %656 = vrot.lane.b32.xlu2 %v654_v21, %s1351_s15 }
 0x1f1   : > { %759 = vrot.lane.b32.xlu0 %v757_v20, %s1352_s17  ;;  %666 = vrot.lane.b32.xlu1 %v664_v51, %s1351_s15 }
 0x1f2   : > { %686 = vrot.lane.b32.xlu2 %v684_v1, %s1351_s15 }
 0x1f9   : > { %789 = vrot.lane.b32.xlu0 %v787_v52, %s1352_s17  ;;  %676 = vrot.lane.b32.xlu1 %v674_v54, %s1351_s15 }
 0x1fa   : > { %716 = vrot.lane.b32.xlu2 %v714_v15, %s1351_s15 }
 0x201   : > { %822 = vrot.lane.b32.xlu0 %v820_v57, %s1353_s18  ;;  %706 = vrot.lane.b32.xlu1 %v704_v18, %s1351_s15  ;;  %v897_v18 = vshrl.u32 %v896_v55, 7  ;;  %s253_s15 = scalar_lea.vmem [#allocation5], %s1773_s14 }
 0x202   : > { %749 = vrot.lane.b32.xlu2 %v747_v3, %s1352_s17  ;;  %s993_s26 = sshll.u32 %s253_s15, 4  ;;  %s994_s26 = int_to_ptr.vmem [resolvable:$true] %s993_s26 }
 0x203   : > { %v898_v3 = vadd.s32 8, %v897_v18 }
 0x209   : > { %852 = vrot.lane.b32.xlu0 %v850_v58, %s1353_s18  ;;  %739 = vrot.lane.b32.xlu1 %v737_v61, %s1352_s17  ;;  %v901_v58 = vmul.u32 2, %v900_v59 }
 0x20a   : > { %779 = vrot.lane.b32.xlu2 %v777_v62, %s1352_s17 }
 0x20b   : > { %vm903_vm3 = vcmp.eq.s32.totalorder %v898_v3, %v901_v58  ;;  %v908_v60 = vadd.s32 1, %v901_v58  ;;  %vm902_vm4 = vcmp.eq.s32.totalorder %v897_v18, %v901_v58 }
 0x20d   : > { %vm910_vm5 = vcmp.eq.s32.totalorder %v898_v3, %v908_v60  ;;  %vm909_vm6 = vcmp.eq.s32.totalorder %v897_v18, %v908_v60 }
 0x211   : > { %882 = vrot.lane.b32.xlu0 %v880_v63, %s1353_s18  ;;  %769 = vrot.lane.b32.xlu1 %v767_v4, %s1352_s17  ;;  %v1354_v4 = vmov 1.0  }
 0x212   : > { %812 = vrot.lane.b32.xlu2 %v810_v8, %s1353_s18  ;;  %1107 = vmatpush.msk.msra.mxu0 %vm903_vm3, %v1354_v4 }
 0x213   : > { %1110 = vmatpush.msk.msra.mxu1 %vm910_vm5, %v1354_v4 }
 0x214   : > { %1108 = vmatpush.msk.msra.mxu0 %vm902_vm4, %v1354_v4 }
 0x215   : > { %1111 = vmatpush.msk.msra.mxu1 %vm909_vm6, %v1354_v4 }
 0x219   : > { %799 = vrot.lane.b32.xlu1 %v797_v56, %s1352_s17  ;;  %s1115_s17 = sshll.u32 %s1411_s25, 3  ;;  %s1264_s25 = scalar_lea.hbm %s1772_s6, 16 }
 0x21a   : > { %842 = vrot.lane.b32.xlu2 %v840_v17, %s1353_s18  ;;  %s991_s20 = scalar_lea.hbm %s1772_s6, %s1115_s17 }
 0x21b   : > { %s995_s28 = sshll.u32 %s991_s20, 4  ;;  %s996_s28 = int_to_ptr.hbm [resolvable:$true] %s995_s28 }
 0x21c   : > { %s1258_s9 = sshra.s32 %s996_s28, 4  ;;  %s1259_s9 = int_to_ptr.hbm [resolvable:$true] %s1258_s9 }
 0x21d   : > { %s1260_s10 = scalar_lea.hbm %s1259_s9, 8  ;;  %p1265_p0 = scmp.lt.s32.totalorder %s1259_s9, %s1772_s6 }
 0x21e   : > { %p1261_p11 = scmp.ne.s32.totalorder %s1259_s9, %s1260_s10  ;;  %p1266_p1 = scmp.lt.s32.totalorder %s1264_s25, %s1260_s10 }
 0x220   : > { %p1262_p12 = pnand %p1261_p11, %p1428_p5  ;;  %p1267_p2 = por %p1266_p1, %p1265_p0 }
 0x221   : > { %832 = vrot.lane.b32.xlu1 %v830_v23, %s1353_s18 }
 0x222   : > { %872 = vrot.lane.b32.xlu2 %v870_v0, %s1353_s18  ;;  %p1263_p13 = pneg %p1262_p12 }
 0x224   : > { %p1268_p3 = pnand %p1267_p2, %p1263_p13 }
 0x229   : > { %862 = vrot.lane.b32.xlu1 %v860_v24, %s1353_s18 }
 0x22c   : > { %v564_v26 = vpop.permute.xlu2 %563 }
 0x22d   : > { %v566_v30 = vadd.f32 %v564_v26, %v1658_v47 }
 0x231   : > { %889 = vperm.xlu1 %1230, %v886_v25  }
 0x234   : > { %v574_v27 = vpop.permute.xlu2 %573 }
 0x235   : > { %v576_v31 = vadd.f32 %v574_v27, %v566_v30 }
 0x23c   : > { %v614_v29 = vpop.permute.xlu2 %613 }
 0x243   : > { %v584_v28 = vpop.permute.xlu1 %583  ;;  %v604_v10 = vpop.permute.xlu0 %603 }
 0x244   : > { %v586_v32 = vadd.f32 %v584_v28, %v576_v31  ;;  %v657_v34 = vpop.permute.xlu2 %656 }
 0x24b   : > { %v594_v5 = vpop.permute.xlu1 %593  ;;  %v647_v36 = vpop.permute.xlu0 %646 }
 0x24c   : > { %v596_v11 = vadd.f32 %v594_v5, %v586_v32  ;;  %v687_v39 = vpop.permute.xlu2 %686 }
 0x24e   : > { %v606_v35 = vadd.f32 %v604_v10, %v596_v11 }
 0x250   : > { %v616_v37 = vadd.f32 %v614_v29, %v606_v35 }
 0x253   : > { %v624_v33 = vpop.permute.xlu1 %623  ;;  %v697_v42 = vpop.permute.xlu0 %696 }
 0x254   : > { %v626_v6 = vadd.f32 %v624_v33, %v616_v37  ;;  %v717_v14 = vpop.permute.xlu2 %716 }
 0x25b   : > { %v634_v7 = vpop.permute.xlu1 %633  ;;  %v730_v47 = vpop.permute.xlu0 %729 }
 0x25c   : > { %v636_v38 = vadd.f32 %v634_v7, %v626_v6  ;;  %v750_v2 = vpop.permute.xlu2 %749 }
 0x25e   : > { %v649_v41 = vadd.f32 %v647_v36, %v636_v38 }
 0x260   : > { %v659_v43 = vadd.f32 %v657_v34, %v649_v41 }
 0x263   : > { %v667_v40 = vpop.permute.xlu1 %666  ;;  %v760_v50 = vpop.permute.xlu0 %759 }
 0x264   : > { %v669_v9 = vadd.f32 %v667_v40, %v659_v43  ;;  %v780_v16 = vpop.permute.xlu2 %779 }
 0x26b   : > { %v677_v44 = vpop.permute.xlu1 %676  ;;  %v790_v53 = vpop.permute.xlu0 %789 }
 0x26c   : > { %v679_v45 = vadd.f32 %v677_v44, %v669_v9  ;;  %v813_v61 = vpop.permute.xlu2 %812 }
 0x26e   : > { %v689_v46 = vadd.f32 %v687_v39, %v679_v45 }
 0x270   : > { %v699_v12 = vadd.f32 %v697_v42, %v689_v46 }
 0x273   : > { %v707_v48 = vpop.permute.xlu1 %706  ;;  %v823_v56 = vpop.permute.xlu0 %822 }
 0x274   : > { %v709_v49 = vadd.f32 %v707_v48, %v699_v12  ;;  %v843_v23 = vpop.permute.xlu2 %842 }
 0x276   : > { %v719_v21 = vadd.f32 %v717_v14, %v709_v49 }
 0x278   : > { %v732_v20 = vadd.f32 %v730_v47, %v719_v21 }
 0x27b   : > { %v740_v51 = vpop.permute.xlu1 %739  ;;  %v853_v25 = vpop.permute.xlu0 %852 }
 0x27c   : > { %v742_v1 = vadd.f32 %v740_v51, %v732_v20  ;;  %v873_v5 = vpop.permute.xlu2 %872 }
 0x27e   : > { %v752_v13 = vadd.f32 %v750_v2, %v742_v1 }
 0x280   : > { %v762_v52 = vadd.f32 %v760_v50, %v752_v13 }
 0x283   : > { %v770_v54 = vpop.permute.xlu1 %769  ;;  %v883_v30 = vpop.permute.xlu0 %882 }
 0x284   : > { %v772_v15 = vadd.f32 %v770_v54, %v762_v52 }
 0x286   : > { %v782_v57 = vadd.f32 %v780_v16, %v772_v15 }
 0x288   : > { %v792_v62 = vadd.f32 %v790_v53, %v782_v57 }
 0x28b   : > { %v800_v63 = vpop.permute.xlu1 %799 }
 0x28c   : > { %v802_v8 = vadd.f32 %v800_v63, %v792_v62 }
 0x28e   : > { %v815_v17 = vadd.f32 %v813_v61, %v802_v8 }
 0x290   : > { %v825_v19 = vadd.f32 %v823_v56, %v815_v17 }
 0x293   : > { %v833_v0 = vpop.permute.xlu1 %832 }
 0x294   : > { %v835_v22 = vadd.f32 %v833_v0, %v825_v19 }
 0x296   : > { %v845_v24 = vadd.f32 %v843_v23, %v835_v22 }
 0x298   : > { %v855_v26 = vadd.f32 %v853_v25, %v845_v24 }
 0x29b   : > { %v863_v27 = vpop.permute.xlu1 %862 }
 0x29c   : > { %v865_v28 = vadd.f32 %v863_v27, %v855_v26 }
 0x29e   : > { %v875_v29 = vadd.f32 %v873_v5, %v865_v28 }
 0x2a0   : > { %v885_v31 = vadd.f32 %v883_v30, %v875_v29 }
 0x2a3   : > { %v890_v10 = vpop.permute.xlu1 %889 }
 0x2a4   : > { %v892_v32 = vadd.f32 %v890_v10, %v885_v31 }
 0x2a6   : > { %v893_v33 = vmax.f32 %v892_v32, 0.0 }
 0x2a8   : > { %1109 = vmatmul.msk.f32.vlgmr.msra.gmra.mxu0 %vm894_vm7, %v893_v33  ;;  %1112 = vmatmul.msk.f32.vlgmr.msra.gmra.mxu1 %vm894_vm7, %v893_v33  ;;  %895 = vst.msk [vmem:[%s253_s15] sm:$0xff] %vm894_vm7, %v893_v33 }
 0x2a9   : > { %1271 = shalt.err (!%p1268_p3)
}
 0x2aa   : > { %1120 = dma.vmem_to_hbm [thread:$0]  (%p1428_p5), %s994_s26, 128, %s996_s28, %s967_s29   ;;  %vm959_vm8 = vcmask 64512  }
 0x2ab   : > { %s977_s19 = scalar_lea.hbm %s1771_s5, %s1115_s17  ;;  %s1778_s20 = sshll.u32 %s1713_s13, 3 }
 0x2ac   : > { %s246_s11 = scalar_lea.vmem [#allocation3], %s1778_s20  ;;  %s981_s0 = sshll.u32 %s977_s19, 4  ;;  %s982_s0 = int_to_ptr.hbm [resolvable:$true] %s981_s0 }
 0x2ad   : > { %s979_s16 = sshll.u32 %s246_s11, 4  ;;  %s962_s14 = scalar_lea.sflag [#allocation4], %s1713_s13  ;;  %s980_s16 = int_to_ptr.vmem [resolvable:$true] %s979_s16 }
 0x2ae   : > { %s1286_s9 = sshra.s32 %s982_s0, 4  ;;  %s1292_s29 = scalar_lea.hbm %s1771_s5, 16  ;;  %s1287_s9 = int_to_ptr.hbm [resolvable:$true] %s1286_s9 }
 0x2af   : > { %s1288_s26 = scalar_lea.hbm %s1287_s9, 8  ;;  %p1293_p9 = scmp.lt.s32.totalorder %s1287_s9, %s1771_s5 }
 0x2b0   : > { %p1289_p4 = scmp.ne.s32.totalorder %s1287_s9, %s1288_s26  ;;  %p1294_p10 = scmp.lt.s32.totalorder %s1292_s29, %s1288_s26 }
 0x2b2   : > { %p1290_p7 = pnand %p1289_p4, %p1428_p5  ;;  %p1295_p11 = por %p1294_p10, %p1293_p9 }
 0x2b4   : > { %p1291_p8 = pneg %p1290_p7 }
 0x2b6   : > { %p1296_p12 = pnand %p1295_p11, %p1291_p8 }
 0x325   : > { %v935_v11 = vpop.f32.mrf.mxu0  ;;  %v955_v34 = vpop.f32.mrf.mxu1 }
 0x326   : > { %v958_v35 = vmax.f32 %v935_v11, %v955_v34 }
 0x328   : > { %960 = vst.msk [vmem:[%s246_s11] sm:$0xff] %vm959_vm8, %v958_v35 }
 0x329   : > { %1299 = shalt.err (!%p1296_p12)
}
 0x32a   : > { %1119 = dma.vmem_to_hbm [thread:$0]  (%p1428_p5), %s980_s16, 128, %s982_s0, %s962_s14  }
 0x32b PF: > { %p1130_p13 = scmp.ge.s32.totalorder %s1338_s24, 2  ;;  %s1007_s13 = sand.u32 1, %s1326_s21  }
 0x32c   : > { %s1008_s12 = scalar_lea.sflag [#allocation4], %s1007_s13 }
 0x32d   : > { %p1124_p0 = pnand %p1130_p13, %p1432_p6 }
 0x32f   : > { %p1125_p1 = pneg %p1124_p0 }
 0x331   : > { %1317 = dma.done.wait (%p1125_p1), %s1008_s12, 128  }
 0x332   : > { %1319 = vsyncadd (%p1125_p1), %s1008_s12, 4294967168  ;;  %s1018_s15 = scalar_lea.sflag [#allocation6], %s1007_s13 }
 0x333   : > { %1321 = dma.done.wait (%p1125_p1), %s1018_s15, 128  }
 0x334   : > { %1323 = vsyncadd (%p1125_p1), %s1018_s15, 4294967168  ;;  %p20_p5 = scmp.ge.s32.totalorder %s1415_s27, 4   ;;  %s1779_s21 = smov %s1330_s22 }
 0x335   : > { %s1780_s22 = smov %s1334_s23  ;;  %s1781_s23 = smov %s1426_s30 }
 0x336   : > { %s1782_s24 = smov %s1415_s27  ;;  %22 = sbr.rel (!%p20_p5) target bundleno = 7 (0x7), region = 100 }
 0x33b   :  { %1024 = vsyncpa [#allocation4], 1 }
 0x33c   :  { %1026 = vsyncpa [#allocation4 + $0x1], 1 }
 0x33d   :  { %1027 = vsyncpa [#allocation6], 1 }
 0x33e   :  { %1029 = vsyncpa [#allocation6 + $0x1], 1 }

</bundles_post_ra>
